<compile_context>
chip_gen: v5e
topology: v5e:2x2
jax: 0.10.0
libtpu: 0.0.40
codegen_flags: <defaults>
</compile_context>

<pallas_src>
import math

import jax
import jax.numpy as jnp
from jax.experimental import pallas as pl
from jax.experimental.pallas import tpu as pltpu


def _round_up(x, m):
    return (x + m - 1) // m * m


def _cdiv(a, b):
    return -(-a // b)


def _erf_f32(x):
    """float32 erf via the Eigen/XLA rational approximation (mul/add + one EUP
    reciprocal, so it always lowers in Mosaic; max abs error ~1e-7 + recip err)."""
    x = jnp.clip(x, -4.0, 4.0)
    x2 = x * x
    p = x2 * (-2.72614225801306e-10) + 2.77068142495902e-08
    p = x2 * p + (-2.10102402082508e-06)
    p = x2 * p + (-5.69250639462346e-05)
    p = x2 * p + (-7.34990630326855e-04)
    p = x2 * p + (-2.95459980854025e-03)
    p = x2 * p + (-1.60960333262415e-02)
    p = x * p
    q = x2 * (-1.45660718464996e-05) + (-2.13374055278905e-04)
    q = x2 * q + (-1.68282697438203e-03)
    q = x2 * q + (-7.37332916720468e-03)
    q = x2 * q + (-1.42647390514189e-02)
    # q < 0 always; use the EUP approximate reciprocal on the positive value.
    return (-p) * pl.reciprocal(-q, approx=True)


def _gelu_exact(x):
    # nn.GELU() default = exact (erf-based) GELU, computed in f32.
    return 0.5 * x * (1.0 + _erf_f32(x * (1.0 / math.sqrt(2.0))))


def fold_weights(w1, w3, w5, wad, wa1, wa2):
    """One-time weight prep (hoisted out of the per-call path).

    Folds the channel adapter and the first attention 1x1 into the 25 tap
    weights of a 5x5 stencil (inactive taps are exact zeros).  Channels are
    padded only to Cr = max(8, round_up(C, 8)) (no 16x zero inflation).

    w1 (cps,C,1,1), w3 (cps,C,3,3), w5 (cps,C,5,5),
    wad (C,3*cps,1,1) or None, wa1 (hidden,C,1,1), wa2 (C,hidden,1,1).
    Returns (w_big (25, hidden, Cr) bf16, wa2_b (C, hidden) bf16).
    """
    cps, C = int(w1.shape[0]), int(w1.shape[1])
    concat = 3 * cps
    hidden = int(wa1.shape[0])
    Cr = max(8, _round_up(C, 8))

    hi = jax.lax.Precision.HIGHEST   # one-time prep, keep it exact

    # tap bank on the 5x5 stencil (25, concat, C); inactive taps stay zero.
    taps = jnp.zeros((25, concat, C), jnp.float32)
    taps = taps.at[2 * 5 + 2, 0:cps, :].set(w1[:, :, 0, 0].astype(jnp.float32))
    for ky in range(3):
        for kx in range(3):
            taps = taps.at[(ky + 1) * 5 + (kx + 1), cps:2 * cps, :].set(
                w3[:, :, ky, kx].astype(jnp.float32))
    for ky in range(5):
        for kx in range(5):
            taps = taps.at[ky * 5 + kx, 2 * cps:3 * cps, :].set(
                w5[:, :, ky, kx].astype(jnp.float32))

    head = wa1[:, :, 0, 0].astype(jnp.float32)                    # (hidden, C)
    if wad is not None:
        head = jnp.matmul(head, wad[:, :, 0, 0].astype(jnp.float32),
                          precision=hi)                           # (hidden, concat)
    # w_eff[t] = head @ taps[t]  -> (25, hidden, C)
    w_eff = jnp.einsum('hc,tcd->thd', head, taps, precision=hi)
    w_eff = jnp.pad(w_eff, ((0, 0), (0, 0), (0, Cr - C)))         # pad channels to Cr
    w_big = w_eff.astype(jnp.bfloat16)                            # (25, hidden, Cr)
    wa2_b = wa2[:, :, 0, 0].astype(jnp.bfloat16)                  # (C, hidden)
    return w_big, wa2_b


def multi_scale_attention(x, w_big, wa2_b):
    """x: (N, C, H, W) f32.  w_big/wa2_b from fold_weights()."""
    N, C, H, W = (int(d) for d in x.shape)
    _, hidden, Cr = (int(d) for d in w_big.shape)

    Wp = W + 4                       # 2 zero-pad cols each side (max kernel 5)
    Lw = H * Wp                      # wide flattened output length (valid cols [0, W))
    halo = 4 * Wp + 4                # max tap offset (ky = kx = 4)
    halo_pad = _round_up(halo, 128)
    groups = _cdiv(Lw, 128)          # 128-lane groups of wide output

    # ---- generation-aware VMEM budget / tile sizing ------------------------------
    try:
        vmem_cap = int(getattr(pltpu.get_tpu_info(), "vmem_capacity_bytes", 64 << 20))
    except Exception:
        vmem_cap = 64 << 20          # conservative (v7x) fallback
    budget = min(int(vmem_cap * 0.8), 100 << 20)      # leave compiler headroom
    # bytes per extra 128 output lanes: x window (dbl-buffered f32) + bf16 window +
    # dbl-buffered output block + live f32 intermediates (h1 / z / attn / x_center).
    per_group = 128 * (2 * Cr * 4 + Cr * 2 + 2 * C * 4 + 6 * hidden + 8 * C)
    fixed = (halo_pad * (2 * Cr * 4 + Cr * 2)
             + (25 * hidden * Cr + C * hidden) * 2 * 4            # weights (generous)
             + (2 << 20))                                         # slack
    tg = max(1, min(groups, 64, (budget - fixed) // per_group))
    R = _cdiv(groups, tg)            # tiles per image
    if N == 1 and R == 1 and groups >= 2:
        tg = _cdiv(groups, 2)        # give both v7x cores work even for a single image
        R = _cdiv(groups, tg)
    Ltile = tg * 128
    G = 2 if (N == 1 and R >= 2) else 1   # parallel chunks per image (1st grid axis)
    Rin = _cdiv(R, G)                     # sequential tiles per chunk (2nd grid axis)
    R_total = G * Rin
    Lpad = R_total * Ltile
    Lwin = Ltile + halo_pad          # x window fetched per grid step (O(tile))
    nbuf = 1 if Rin == 1 else 2      # double-buffer only when there is a next tile

    # ---- single fused wrapper pad: channels->Cr, 2 rows top, bpad bottom, 2 cols l/r
    Lneeded = R_total * Ltile + halo_pad
    bpad = max(3, _cdiv(max(0, Lneeded - (H + 2) * Wp), Wp))
    Hp = H + 2 + bpad
    Lslab = Hp * Wp                  # >= Lneeded by construction (all DMA reads in-bounds)
    xp = jnp.pad(x, ((0, 0), (0, Cr - C), (2, bpad), (2, 2))).reshape(N, Cr, Lslab)

    # ---- kernel -------------------------------------------------------------------
    def kernel(x_hbm, wb_ref, wa2_ref, o_ref, xwin, xbf, sem):
        p = pl.program_id(0)
        ri = pl.program_id(1)
        if G == 1:
            n, r = p, ri
        else:
            n = p // G
            r = (p % G) * Rin + ri

        def window_copy(rr, sl):
            st = pl.multiple_of(rr * Ltile, 128)
            return pltpu.make_async_copy(
                x_hbm.at[n, :, pl.ds(st, Lwin)], xwin.at[sl], sem.at[sl])

        if Rin == 1:
            # nothing to prefetch: single-buffered fetch of the current window
            slot = 0
            window_copy(r, 0).start()
            window_copy(r, 0).wait()
        else:
            # manual double-buffered halo-window pipeline along the sequential r axis
            slot = ri % 2

            @pl.when(ri == 0)
            def _():
                window_copy(r, slot).start()

            window_copy(r, slot).wait()

            @pl.when(ri + 1 < Rin)
            def _():
                window_copy(r + 1, 1 - slot).start()

        # one f32 -> bf16 pass over the window; feeds all 25 tap matmuls
        # (no im2col scratch and no per-tap vector stores at all).
        xbf[...] = xwin[slot].astype(jnp.bfloat16)

        # 25 accumulate-matmuls (K = Cr each, tightly packed taps), f32 accumulation.
        h = jnp.zeros((hidden, Ltile), jnp.float32)
        for ky in range(5):
            for kx in range(5):
                off = ky * Wp + kx                     # static slice start
                h = h + jnp.dot(wb_ref[ky * 5 + kx], xbf[:, pl.ds(off, Ltile)],
                                preferred_element_type=jnp.float32)
        # TODO(synk): derive the 4 kx shifts per ky with pltpu.roll (XLU) to cut the
        # unaligned bf16 slice loads ~5x (mostly a v5e win).

        h = _gelu_exact(h)                              # f32 elementwise (v5e-safe)
        z = jnp.dot(wa2_ref[...], h.astype(jnp.bfloat16),
                    preferred_element_type=jnp.float32)  # (C, Ltile) f32
        attn = pl.reciprocal(1.0 + jnp.exp(-z), approx=True)   # sigmoid, EUP recip

        x_center = xwin[slot, :C, pl.ds(2 * Wp + 2, Ltile)]    # gate with original f32 x
        o_ref[...] = (x_center * attn).astype(o_ref.dtype)

    # ---- VMEM footprint / compiler params (footprint <= budget <= ceiling) ---------
    foot = (nbuf * Cr * Lwin * 4 + Cr * Lwin * 2 + 2 * C * Ltile * 4
            + (25 * hidden * Cr + C * hidden) * 2 * 4
            + (6 * hidden + 8 * C) * Ltile + (2 << 20))
    ceiling = max(32 << 20, min(vmem_cap - (8 << 20), 112 << 20))
    vmem_limit = int(min(max(int(foot * 1.25), 32 << 20), ceiling))

    if G == 1:
        out_map = lambda pp, rr: (pp, 0, rr)
    else:
        out_map = lambda pp, rr: (pp // G, 0, (pp % G) * Rin + rr)

    out_wide = pl.pallas_call(
        kernel,
        out_shape=jax.ShapeDtypeStruct((N, C, Lpad), x.dtype),
        grid=(N * G, Rin),
        in_specs=[pl.BlockSpec(memory_space=pl.ANY),             # x slab stays in HBM
                  pl.BlockSpec((25, hidden, Cr), lambda pp, rr: (0, 0, 0)),
                  pl.BlockSpec((C, hidden), lambda pp, rr: (0, 0))],
        out_specs=pl.BlockSpec((None, C, Ltile), out_map),
        scratch_shapes=[pltpu.VMEM((nbuf, Cr, Lwin), jnp.float32),
                        pltpu.VMEM((Cr, Lwin), jnp.bfloat16),
                        pltpu.SemaphoreType.DMA((nbuf,))],
        compiler_params=pltpu.CompilerParams(
            dimension_semantics=("parallel", "arbitrary"),
            vmem_limit_bytes=vmem_limit),
    )(xp, w_big, wa2_b)

    # drop padded lanes and the Wp-W dead columns -> (N, C, H, W)
    # TODO(synk): for narrow images the 4/(W+4) dead columns of the wide flattened
    # layout are still carried through the matmuls; an H-tiled dense layout would
    # recover them (left as-is per the review's "W >= ~512 leave as-is" guidance).
    return out_wide[:, :, :Lw].reshape(N, C, H, Wp)[:, :, :, :W]


# --- pure-JAX reference (numerical sanity check) ----------------------------------
def reference_forward(x, w1, w3, w5, wad, wa1, wa2):
    def conv(t, w, p):
        return jax.lax.conv_general_dilated(
            t, w, (1, 1), [(p, p), (p, p)],
            dimension_numbers=("NCHW", "OIHW", "NCHW"),
            precision=jax.lax.Precision.HIGHEST)
    ms = jnp.concatenate([conv(x, w1, 0), conv(x, w3, 1), conv(x, w5, 2)], axis=1)
    if wad is not None:
        ms = conv(ms, wad, 0)
    h = jax.nn.gelu(conv(ms, wa1, 0), approximate=False)
    attn = jax.nn.sigmoid(conv(h, wa2, 0))
    return x * attn


if __name__ == "__main__":
    N, C, H, W = 2, 4, 16, 16      # channels=4 -> cps=1, concat=3 (adapter used), hidden=8
    cps = max(1, C // 3)
    concat = 3 * cps
    hidden = max(8, C // 4)

    key = jax.random.PRNGKey(0)
    k1, k2, k3, k4, k5, k6, kx = jax.random.split(key, 7)
    w1 = jax.random.normal(k1, (cps, C, 1, 1), jnp.float32) / math.sqrt(C * 1 * 1)
    w3 = jax.random.normal(k2, (cps, C, 3, 3), jnp.float32) / math.sqrt(C * 3 * 3)
    w5 = jax.random.normal(k3, (cps, C, 5, 5), jnp.float32) / math.sqrt(C * 5 * 5)
    wad = (jax.random.normal(k4, (C, concat, 1, 1), jnp.float32) / math.sqrt(concat)
           if concat != C else None)
    wa1 = jax.random.normal(k5, (hidden, C, 1, 1), jnp.float32) / math.sqrt(C)
    wa2 = jax.random.normal(k6, (C, hidden, 1, 1), jnp.float32) / math.sqrt(hidden)
    x = jax.random.normal(kx, (N, C, H, W), jnp.float32)

    # one-time weight folding (hoisted out of the per-call path)
    w_big, wa2_b = jax.block_until_ready(fold_weights(w1, w3, w5, wad, wa1, wa2))

    out = jax.block_until_ready(multi_scale_attention(x, w_big, wa2_b))
    assert out.shape == x.shape and out.dtype == x.dtype

    ref = reference_forward(x, w1, w3, w5, wad, wa1, wa2)
    scale = float(jnp.max(jnp.abs(ref)))
    err = float(jnp.max(jnp.abs(out - ref)))
    tol = 3e-2 * scale + 1e-3      # bf16 MXU operands vs f32-HIGHEST reference
    if err > tol:
        raise AssertionError(f"kernel/reference mismatch: max abs err={err}, tol={tol}")
    print("KERNEL_OK")
</pallas_src>

<mosaic_0001>
module attributes {stable_mosaic.version = 11 : i64} {
  func.func @kernel(%arg0: i32, %arg1: i32, %arg2: memref<2x8x520xf32, #tpu.memory_space<any>>, %arg3: memref<25x8x8xbf16, #tpu.memory_space<vmem>>, %arg4: memref<4x8xbf16, #tpu.memory_space<vmem>>, %arg5: memref<1x4x384xf32, #tpu.memory_space<vmem>>, %arg6: memref<1x8x512xf32, #tpu.memory_space<vmem>>, %arg7: memref<8x512xbf16, #tpu.memory_space<vmem>>, %arg8: memref<1x!tpu.dma_semaphore, #tpu.memory_space<semaphore_mem>>) attributes {dimension_semantics = [#tpu.dimension_semantics<parallel>, #tpu.dimension_semantics<arbitrary>], iteration_bounds = array<i64: 2, 1>, scalar_prefetch = 0 : i64, scratch_operands = 3 : i64, tpu.core_type = #tpu.core_type<tc>, window_params = [{}, {pipeline_mode = #tpu.pipeline_mode<synchronous>, transform_indices = @transform_1, window_bounds = array<i64: 25, 8, 8>}, {pipeline_mode = #tpu.pipeline_mode<synchronous>, transform_indices = @transform_2, window_bounds = array<i64: 4, 8>}, {transform_indices = @transform_3, window_bounds = array<i64: 1, 4, 384>}]} {
    %c384_i32 = arith.constant 384 : i32
    %0 = arith.muli %arg1, %c384_i32 : i32
    %1 = tpu.assume_multiple %0, 128 : i32
    %c0_i32 = arith.constant 0 : i32
    %c0_i32_0 = arith.constant 0 : i32
    %c0_i32_1 = arith.constant 0 : i32
    %2 = tpu.memref_slice %arg2[%arg0, %c0_i32_1, %1] : memref<2x8x520xf32, #tpu.memory_space<any>> -> memref<1x8x512xf32, #tpu.memory_space<any>>
    %3 = tpu.memref_squeeze %2 : memref<1x8x512xf32, #tpu.memory_space<any>> -> memref<8x512xf32, #tpu.memory_space<any>>
    %c0_i32_2 = arith.constant 0 : i32
    %c0_i32_3 = arith.constant 0 : i32
    %4 = tpu.memref_slice %arg6[%c0_i32, %c0_i32_2, %c0_i32_3] : memref<1x8x512xf32, #tpu.memory_space<vmem>> -> memref<1x8x512xf32, #tpu.memory_space<vmem>>
    %5 = tpu.memref_squeeze %4 : memref<1x8x512xf32, #tpu.memory_space<vmem>> -> memref<8x512xf32, #tpu.memory_space<vmem>>
    %6 = tpu.memref_slice %arg8[%c0_i32_0] : memref<1x!tpu.dma_semaphore, #tpu.memory_space<semaphore_mem>> -> memref<1x!tpu.dma_semaphore, #tpu.memory_space<semaphore_mem>>
    %7 = tpu.memref_squeeze %6 : memref<1x!tpu.dma_semaphore, #tpu.memory_space<semaphore_mem>> -> memref<!tpu.dma_semaphore, #tpu.memory_space<semaphore_mem>>
    tpu.enqueue_dma source(%3 : memref<8x512xf32, #tpu.memory_space<any>>) target(%5 : memref<8x512xf32, #tpu.memory_space<vmem>>) target_semaphore(%7 : memref<!tpu.dma_semaphore, #tpu.memory_space<semaphore_mem>>)
    %c384_i32_4 = arith.constant 384 : i32
    %8 = arith.muli %arg1, %c384_i32_4 : i32
    %9 = tpu.assume_multiple %8, 128 : i32
    %c0_i32_5 = arith.constant 0 : i32
    %c0_i32_6 = arith.constant 0 : i32
    %c0_i32_7 = arith.constant 0 : i32
    %10 = tpu.memref_slice %arg2[%arg0, %c0_i32_7, %9] : memref<2x8x520xf32, #tpu.memory_space<any>> -> memref<1x8x512xf32, #tpu.memory_space<any>>
    %11 = tpu.memref_squeeze %10 : memref<1x8x512xf32, #tpu.memory_space<any>> -> memref<8x512xf32, #tpu.memory_space<any>>
    %c0_i32_8 = arith.constant 0 : i32
    %c0_i32_9 = arith.constant 0 : i32
    %12 = tpu.memref_slice %arg6[%c0_i32_5, %c0_i32_8, %c0_i32_9] : memref<1x8x512xf32, #tpu.memory_space<vmem>> -> memref<1x8x512xf32, #tpu.memory_space<vmem>>
    %13 = tpu.memref_squeeze %12 : memref<1x8x512xf32, #tpu.memory_space<vmem>> -> memref<8x512xf32, #tpu.memory_space<vmem>>
    %14 = tpu.memref_slice %arg8[%c0_i32_6] : memref<1x!tpu.dma_semaphore, #tpu.memory_space<semaphore_mem>> -> memref<1x!tpu.dma_semaphore, #tpu.memory_space<semaphore_mem>>
    %15 = tpu.memref_squeeze %14 : memref<1x!tpu.dma_semaphore, #tpu.memory_space<semaphore_mem>> -> memref<!tpu.dma_semaphore, #tpu.memory_space<semaphore_mem>>
    tpu.wait_dma2 semaphore(%15 : memref<!tpu.dma_semaphore, #tpu.memory_space<semaphore_mem>>) src(%11 : memref<8x512xf32, #tpu.memory_space<any>>) dst(%13 : memref<8x512xf32, #tpu.memory_space<vmem>>)
    %c0 = arith.constant 0 : index
    %c0_10 = arith.constant 0 : index
    %c0_11 = arith.constant 0 : index
    %16 = vector.load %arg6[%c0, %c0_10, %c0_11] : memref<1x8x512xf32, #tpu.memory_space<vmem>>, vector<1x8x512xf32>
    %17 = vector.shape_cast %16 : vector<1x8x512xf32> to vector<8x512xf32>
    %18 = arith.truncf %17 : vector<8x512xf32> to vector<8x512xbf16>
    %c0_12 = arith.constant 0 : index
    %c0_13 = arith.constant 0 : index
    %19 = vector.load %arg7[%c0_12, %c0_13] : memref<8x512xbf16, #tpu.memory_space<vmem>>, vector<8x512xbf16>
    tpu.vector_store %arg7[%c0_12, %c0_13], %18 {strides = array<i32>} : memref<8x512xbf16, #tpu.memory_space<vmem>>, vector<8x512xbf16>,
    %cst = arith.constant 0.000000e+00 : f32
    %20 = vector.broadcast %cst : f32 to vector<8x384xf32>
    %c0_14 = arith.constant 0 : index
    %c0_15 = arith.constant 0 : index
    %c0_16 = arith.constant 0 : index
    %21 = vector.load %arg3[%c0_14, %c0_15, %c0_16] : memref<25x8x8xbf16, #tpu.memory_space<vmem>>, vector<1x8x8xbf16>
    %22 = vector.shape_cast %21 : vector<1x8x8xbf16> to vector<8x8xbf16>
    %c0_17 = arith.constant 0 : index
    %c0_18 = arith.constant 0 : index
    %23 = vector.load %arg7[%c0_17, %c0_18] : memref<8x512xbf16, #tpu.memory_space<vmem>>, vector<8x384xbf16>
    %cst_19 = arith.constant dense<0.000000e+00> : vector<8x384xf32>
    %24 = tpu.matmul %22, %23, %cst_19 {dimension_numbers = #tpu.dot_dimension_numbers<[1], [0], [0], [1], [0, 0, 1, 1], [], []>} : vector<8x8xbf16>, vector<8x384xbf16>, vector<8x384xf32> -> vector<8x384xf32>
    %25 = arith.addf %20, %24 : vector<8x384xf32>
    %c1 = arith.constant 1 : index
    %c0_20 = arith.constant 0 : index
    %c0_21 = arith.constant 0 : index
    %26 = vector.load %arg3[%c1, %c0_20, %c0_21] : memref<25x8x8xbf16, #tpu.memory_space<vmem>>, vector<1x8x8xbf16>
    %27 = vector.shape_cast %26 : vector<1x8x8xbf16> to vector<8x8xbf16>
    %c0_22 = arith.constant 0 : index
    %c1_23 = arith.constant 1 : index
    %28 = vector.load %arg7[%c0_22, %c1_23] : memref<8x512xbf16, #tpu.memory_space<vmem>>, vector<8x384xbf16>
    %cst_24 = arith.constant dense<0.000000e+00> : vector<8x384xf32>
    %29 = tpu.matmul %27, %28, %cst_24 {dimension_numbers = #tpu.dot_dimension_numbers<[1], [0], [0], [1], [0, 0, 1, 1], [], []>} : vector<8x8xbf16>, vector<8x384xbf16>, vector<8x384xf32> -> vector<8x384xf32>
    %30 = arith.addf %25, %29 : vector<8x384xf32>
    %c2 = arith.constant 2 : index
    %c0_25 = arith.constant 0 : index
    %c0_26 = arith.constant 0 : index
    %31 = vector.load %arg3[%c2, %c0_25, %c0_26] : memref<25x8x8xbf16, #tpu.memory_space<vmem>>, vector<1x8x8xbf16>
    %32 = vector.shape_cast %31 : vector<1x8x8xbf16> to vector<8x8xbf16>
    %c0_27 = arith.constant 0 : index
    %c2_28 = arith.constant 2 : index
    %33 = vector.load %arg7[%c0_27, %c2_28] : memref<8x512xbf16, #tpu.memory_space<vmem>>, vector<8x384xbf16>
    %cst_29 = arith.constant dense<0.000000e+00> : vector<8x384xf32>
    %34 = tpu.matmul %32, %33, %cst_29 {dimension_numbers = #tpu.dot_dimension_numbers<[1], [0], [0], [1], [0, 0, 1, 1], [], []>} : vector<8x8xbf16>, vector<8x384xbf16>, vector<8x384xf32> -> vector<8x384xf32>
    %35 = arith.addf %30, %34 : vector<8x384xf32>
    %c3 = arith.constant 3 : index
    %c0_30 = arith.constant 0 : index
    %c0_31 = arith.constant 0 : index
    %36 = vector.load %arg3[%c3, %c0_30, %c0_31] : memref<25x8x8xbf16, #tpu.memory_space<vmem>>, vector<1x8x8xbf16>
    %37 = vector.shape_cast %36 : vector<1x8x8xbf16> to vector<8x8xbf16>
    %c0_32 = arith.constant 0 : index
    %c3_33 = arith.constant 3 : index
    %38 = vector.load %arg7[%c0_32, %c3_33] : memref<8x512xbf16, #tpu.memory_space<vmem>>, vector<8x384xbf16>
    %cst_34 = arith.constant dense<0.000000e+00> : vector<8x384xf32>
    %39 = tpu.matmul %37, %38, %cst_34 {dimension_numbers = #tpu.dot_dimension_numbers<[1], [0], [0], [1], [0, 0, 1, 1], [], []>} : vector<8x8xbf16>, vector<8x384xbf16>, vector<8x384xf32> -> vector<8x384xf32>
    %40 = arith.addf %35, %39 : vector<8x384xf32>
    %c4 = arith.constant 4 : index
    %c0_35 = arith.constant 0 : index
    %c0_36 = arith.constant 0 : index
    %41 = vector.load %arg3[%c4, %c0_35, %c0_36] : memref<25x8x8xbf16, #tpu.memory_space<vmem>>, vector<1x8x8xbf16>
    %42 = vector.shape_cast %41 : vector<1x8x8xbf16> to vector<8x8xbf16>
    %c0_37 = arith.constant 0 : index
    %c4_38 = arith.constant 4 : index
    %43 = vector.load %arg7[%c0_37, %c4_38] : memref<8x512xbf16, #tpu.memory_space<vmem>>, vector<8x384xbf16>
    %cst_39 = arith.constant dense<0.000000e+00> : vector<8x384xf32>
    %44 = tpu.matmul %42, %43, %cst_39 {dimension_numbers = #tpu.dot_dimension_numbers<[1], [0], [0], [1], [0, 0, 1, 1], [], []>} : vector<8x8xbf16>, vector<8x384xbf16>, vector<8x384xf32> -> vector<8x384xf32>
    %45 = arith.addf %40, %44 : vector<8x384xf32>
    %c5 = arith.constant 5 : index
    %c0_40 = arith.constant 0 : index
    %c0_41 = arith.constant 0 : index
    %46 = vector.load %arg3[%c5, %c0_40, %c0_41] : memref<25x8x8xbf16, #tpu.memory_space<vmem>>, vector<1x8x8xbf16>
    %47 = vector.shape_cast %46 : vector<1x8x8xbf16> to vector<8x8xbf16>
    %c0_42 = arith.constant 0 : index
    %c20 = arith.constant 20 : index
    %48 = vector.load %arg7[%c0_42, %c20] : memref<8x512xbf16, #tpu.memory_space<vmem>>, vector<8x384xbf16>
    %cst_43 = arith.constant dense<0.000000e+00> : vector<8x384xf32>
    %49 = tpu.matmul %47, %48, %cst_43 {dimension_numbers = #tpu.dot_dimension_numbers<[1], [0], [0], [1], [0, 0, 1, 1], [], []>} : vector<8x8xbf16>, vector<8x384xbf16>, vector<8x384xf32> -> vector<8x384xf32>
    %50 = arith.addf %45, %49 : vector<8x384xf32>
    %c6 = arith.constant 6 : index
    %c0_44 = arith.constant 0 : index
    %c0_45 = arith.constant 0 : index
    %51 = vector.load %arg3[%c6, %c0_44, %c0_45] : memref<25x8x8xbf16, #tpu.memory_space<vmem>>, vector<1x8x8xbf16>
    %52 = vector.shape_cast %51 : vector<1x8x8xbf16> to vector<8x8xbf16>
    %c0_46 = arith.constant 0 : index
    %c21 = arith.constant 21 : index
    %53 = vector.load %arg7[%c0_46, %c21] : memref<8x512xbf16, #tpu.memory_space<vmem>>, vector<8x384xbf16>
    %cst_47 = arith.constant dense<0.000000e+00> : vector<8x384xf32>
    %54 = tpu.matmul %52, %53, %cst_47 {dimension_numbers = #tpu.dot_dimension_numbers<[1], [0], [0], [1], [0, 0, 1, 1], [], []>} : vector<8x8xbf16>, vector<8x384xbf16>, vector<8x384xf32> -> vector<8x384xf32>
    %55 = arith.addf %50, %54 : vector<8x384xf32>
    %c7 = arith.constant 7 : index
    %c0_48 = arith.constant 0 : index
    %c0_49 = arith.constant 0 : index
    %56 = vector.load %arg3[%c7, %c0_48, %c0_49] : memref<25x8x8xbf16, #tpu.memory_space<vmem>>, vector<1x8x8xbf16>
    %57 = vector.shape_cast %56 : vector<1x8x8xbf16> to vector<8x8xbf16>
    %c0_50 = arith.constant 0 : index
    %c22 = arith.constant 22 : index
    %58 = vector.load %arg7[%c0_50, %c22] : memref<8x512xbf16, #tpu.memory_space<vmem>>, vector<8x384xbf16>
    %cst_51 = arith.constant dense<0.000000e+00> : vector<8x384xf32>
    %59 = tpu.matmul %57, %58, %cst_51 {dimension_numbers = #tpu.dot_dimension_numbers<[1], [0], [0], [1], [0, 0, 1, 1], [], []>} : vector<8x8xbf16>, vector<8x384xbf16>, vector<8x384xf32> -> vector<8x384xf32>
    %60 = arith.addf %55, %59 : vector<8x384xf32>
    %c8 = arith.constant 8 : index
    %c0_52 = arith.constant 0 : index
    %c0_53 = arith.constant 0 : index
    %61 = vector.load %arg3[%c8, %c0_52, %c0_53] : memref<25x8x8xbf16, #tpu.memory_space<vmem>>, vector<1x8x8xbf16>
    %62 = vector.shape_cast %61 : vector<1x8x8xbf16> to vector<8x8xbf16>
    %c0_54 = arith.constant 0 : index
    %c23 = arith.constant 23 : index
    %63 = vector.load %arg7[%c0_54, %c23] : memref<8x512xbf16, #tpu.memory_space<vmem>>, vector<8x384xbf16>
    %cst_55 = arith.constant dense<0.000000e+00> : vector<8x384xf32>
    %64 = tpu.matmul %62, %63, %cst_55 {dimension_numbers = #tpu.dot_dimension_numbers<[1], [0], [0], [1], [0, 0, 1, 1], [], []>} : vector<8x8xbf16>, vector<8x384xbf16>, vector<8x384xf32> -> vector<8x384xf32>
    %65 = arith.addf %60, %64 : vector<8x384xf32>
    %c9 = arith.constant 9 : index
    %c0_56 = arith.constant 0 : index
    %c0_57 = arith.constant 0 : index
    %66 = vector.load %arg3[%c9, %c0_56, %c0_57] : memref<25x8x8xbf16, #tpu.memory_space<vmem>>, vector<1x8x8xbf16>
    %67 = vector.shape_cast %66 : vector<1x8x8xbf16> to vector<8x8xbf16>
    %c0_58 = arith.constant 0 : index
    %c24 = arith.constant 24 : index
    %68 = vector.load %arg7[%c0_58, %c24] : memref<8x512xbf16, #tpu.memory_space<vmem>>, vector<8x384xbf16>
    %cst_59 = arith.constant dense<0.000000e+00> : vector<8x384xf32>
    %69 = tpu.matmul %67, %68, %cst_59 {dimension_numbers = #tpu.dot_dimension_numbers<[1], [0], [0], [1], [0, 0, 1, 1], [], []>} : vector<8x8xbf16>, vector<8x384xbf16>, vector<8x384xf32> -> vector<8x384xf32>
    %70 = arith.addf %65, %69 : vector<8x384xf32>
    %c10 = arith.constant 10 : index
    %c0_60 = arith.constant 0 : index
    %c0_61 = arith.constant 0 : index
    %71 = vector.load %arg3[%c10, %c0_60, %c0_61] : memref<25x8x8xbf16, #tpu.memory_space<vmem>>, vector<1x8x8xbf16>
    %72 = vector.shape_cast %71 : vector<1x8x8xbf16> to vector<8x8xbf16>
    %c0_62 = arith.constant 0 : index
    %c40 = arith.constant 40 : index
    %73 = vector.load %arg7[%c0_62, %c40] : memref<8x512xbf16, #tpu.memory_space<vmem>>, vector<8x384xbf16>
    %cst_63 = arith.constant dense<0.000000e+00> : vector<8x384xf32>
    %74 = tpu.matmul %72, %73, %cst_63 {dimension_numbers = #tpu.dot_dimension_numbers<[1], [0], [0], [1], [0, 0, 1, 1], [], []>} : vector<8x8xbf16>, vector<8x384xbf16>, vector<8x384xf32> -> vector<8x384xf32>
    %75 = arith.addf %70, %74 : vector<8x384xf32>
    %c11 = arith.constant 11 : index
    %c0_64 = arith.constant 0 : index
    %c0_65 = arith.constant 0 : index
    %76 = vector.load %arg3[%c11, %c0_64, %c0_65] : memref<25x8x8xbf16, #tpu.memory_space<vmem>>, vector<1x8x8xbf16>
    %77 = vector.shape_cast %76 : vector<1x8x8xbf16> to vector<8x8xbf16>
    %c0_66 = arith.constant 0 : index
    %c41 = arith.constant 41 : index
    %78 = vector.load %arg7[%c0_66, %c41] : memref<8x512xbf16, #tpu.memory_space<vmem>>, vector<8x384xbf16>
    %cst_67 = arith.constant dense<0.000000e+00> : vector<8x384xf32>
    %79 = tpu.matmul %77, %78, %cst_67 {dimension_numbers = #tpu.dot_dimension_numbers<[1], [0], [0], [1], [0, 0, 1, 1], [], []>} : vector<8x8xbf16>, vector<8x384xbf16>, vector<8x384xf32> -> vector<8x384xf32>
    %80 = arith.addf %75, %79 : vector<8x384xf32>
    %c12 = arith.constant 12 : index
    %c0_68 = arith.constant 0 : index
    %c0_69 = arith.constant 0 : index
    %81 = vector.load %arg3[%c12, %c0_68, %c0_69] : memref<25x8x8xbf16, #tpu.memory_space<vmem>>, vector<1x8x8xbf16>
    %82 = vector.shape_cast %81 : vector<1x8x8xbf16> to vector<8x8xbf16>
    %c0_70 = arith.constant 0 : index
    %c42 = arith.constant 42 : index
    %83 = vector.load %arg7[%c0_70, %c42] : memref<8x512xbf16, #tpu.memory_space<vmem>>, vector<8x384xbf16>
    %cst_71 = arith.constant dense<0.000000e+00> : vector<8x384xf32>
    %84 = tpu.matmul %82, %83, %cst_71 {dimension_numbers = #tpu.dot_dimension_numbers<[1], [0], [0], [1], [0, 0, 1, 1], [], []>} : vector<8x8xbf16>, vector<8x384xbf16>, vector<8x384xf32> -> vector<8x384xf32>
    %85 = arith.addf %80, %84 : vector<8x384xf32>
    %c13 = arith.constant 13 : index
    %c0_72 = arith.constant 0 : index
    %c0_73 = arith.constant 0 : index
    %86 = vector.load %arg3[%c13, %c0_72, %c0_73] : memref<25x8x8xbf16, #tpu.memory_space<vmem>>, vector<1x8x8xbf16>
    %87 = vector.shape_cast %86 : vector<1x8x8xbf16> to vector<8x8xbf16>
    %c0_74 = arith.constant 0 : index
    %c43 = arith.constant 43 : index
    %88 = vector.load %arg7[%c0_74, %c43] : memref<8x512xbf16, #tpu.memory_space<vmem>>, vector<8x384xbf16>
    %cst_75 = arith.constant dense<0.000000e+00> : vector<8x384xf32>
    %89 = tpu.matmul %87, %88, %cst_75 {dimension_numbers = #tpu.dot_dimension_numbers<[1], [0], [0], [1], [0, 0, 1, 1], [], []>} : vector<8x8xbf16>, vector<8x384xbf16>, vector<8x384xf32> -> vector<8x384xf32>
    %90 = arith.addf %85, %89 : vector<8x384xf32>
    %c14 = arith.constant 14 : index
    %c0_76 = arith.constant 0 : index
    %c0_77 = arith.constant 0 : index
    %91 = vector.load %arg3[%c14, %c0_76, %c0_77] : memref<25x8x8xbf16, #tpu.memory_space<vmem>>, vector<1x8x8xbf16>
    %92 = vector.shape_cast %91 : vector<1x8x8xbf16> to vector<8x8xbf16>
    %c0_78 = arith.constant 0 : index
    %c44 = arith.constant 44 : index
    %93 = vector.load %arg7[%c0_78, %c44] : memref<8x512xbf16, #tpu.memory_space<vmem>>, vector<8x384xbf16>
    %cst_79 = arith.constant dense<0.000000e+00> : vector<8x384xf32>
    %94 = tpu.matmul %92, %93, %cst_79 {dimension_numbers = #tpu.dot_dimension_numbers<[1], [0], [0], [1], [0, 0, 1, 1], [], []>} : vector<8x8xbf16>, vector<8x384xbf16>, vector<8x384xf32> -> vector<8x384xf32>
    %95 = arith.addf %90, %94 : vector<8x384xf32>
    %c15 = arith.constant 15 : index
    %c0_80 = arith.constant 0 : index
    %c0_81 = arith.constant 0 : index
    %96 = vector.load %arg3[%c15, %c0_80, %c0_81] : memref<25x8x8xbf16, #tpu.memory_space<vmem>>, vector<1x8x8xbf16>
    %97 = vector.shape_cast %96 : vector<1x8x8xbf16> to vector<8x8xbf16>
    %c0_82 = arith.constant 0 : index
    %c60 = arith.constant 60 : index
    %98 = vector.load %arg7[%c0_82, %c60] : memref<8x512xbf16, #tpu.memory_space<vmem>>, vector<8x384xbf16>
    %cst_83 = arith.constant dense<0.000000e+00> : vector<8x384xf32>
    %99 = tpu.matmul %97, %98, %cst_83 {dimension_numbers = #tpu.dot_dimension_numbers<[1], [0], [0], [1], [0, 0, 1, 1], [], []>} : vector<8x8xbf16>, vector<8x384xbf16>, vector<8x384xf32> -> vector<8x384xf32>
    %100 = arith.addf %95, %99 : vector<8x384xf32>
    %c16 = arith.constant 16 : index
    %c0_84 = arith.constant 0 : index
    %c0_85 = arith.constant 0 : index
    %101 = vector.load %arg3[%c16, %c0_84, %c0_85] : memref<25x8x8xbf16, #tpu.memory_space<vmem>>, vector<1x8x8xbf16>
    %102 = vector.shape_cast %101 : vector<1x8x8xbf16> to vector<8x8xbf16>
    %c0_86 = arith.constant 0 : index
    %c61 = arith.constant 61 : index
    %103 = vector.load %arg7[%c0_86, %c61] : memref<8x512xbf16, #tpu.memory_space<vmem>>, vector<8x384xbf16>
    %cst_87 = arith.constant dense<0.000000e+00> : vector<8x384xf32>
    %104 = tpu.matmul %102, %103, %cst_87 {dimension_numbers = #tpu.dot_dimension_numbers<[1], [0], [0], [1], [0, 0, 1, 1], [], []>} : vector<8x8xbf16>, vector<8x384xbf16>, vector<8x384xf32> -> vector<8x384xf32>
    %105 = arith.addf %100, %104 : vector<8x384xf32>
    %c17 = arith.constant 17 : index
    %c0_88 = arith.constant 0 : index
    %c0_89 = arith.constant 0 : index
    %106 = vector.load %arg3[%c17, %c0_88, %c0_89] : memref<25x8x8xbf16, #tpu.memory_space<vmem>>, vector<1x8x8xbf16>
    %107 = vector.shape_cast %106 : vector<1x8x8xbf16> to vector<8x8xbf16>
    %c0_90 = arith.constant 0 : index
    %c62 = arith.constant 62 : index
    %108 = vector.load %arg7[%c0_90, %c62] : memref<8x512xbf16, #tpu.memory_space<vmem>>, vector<8x384xbf16>
    %cst_91 = arith.constant dense<0.000000e+00> : vector<8x384xf32>
    %109 = tpu.matmul %107, %108, %cst_91 {dimension_numbers = #tpu.dot_dimension_numbers<[1], [0], [0], [1], [0, 0, 1, 1], [], []>} : vector<8x8xbf16>, vector<8x384xbf16>, vector<8x384xf32> -> vector<8x384xf32>
    %110 = arith.addf %105, %109 : vector<8x384xf32>
    %c18 = arith.constant 18 : index
    %c0_92 = arith.constant 0 : index
    %c0_93 = arith.constant 0 : index
    %111 = vector.load %arg3[%c18, %c0_92, %c0_93] : memref<25x8x8xbf16, #tpu.memory_space<vmem>>, vector<1x8x8xbf16>
    %112 = vector.shape_cast %111 : vector<1x8x8xbf16> to vector<8x8xbf16>
    %c0_94 = arith.constant 0 : index
    %c63 = arith.constant 63 : index
    %113 = vector.load %arg7[%c0_94, %c63] : memref<8x512xbf16, #tpu.memory_space<vmem>>, vector<8x384xbf16>
    %cst_95 = arith.constant dense<0.000000e+00> : vector<8x384xf32>
    %114 = tpu.matmul %112, %113, %cst_95 {dimension_numbers = #tpu.dot_dimension_numbers<[1], [0], [0], [1], [0, 0, 1, 1], [], []>} : vector<8x8xbf16>, vector<8x384xbf16>, vector<8x384xf32> -> vector<8x384xf32>
    %115 = arith.addf %110, %114 : vector<8x384xf32>
    %c19 = arith.constant 19 : index
    %c0_96 = arith.constant 0 : index
    %c0_97 = arith.constant 0 : index
    %116 = vector.load %arg3[%c19, %c0_96, %c0_97] : memref<25x8x8xbf16, #tpu.memory_space<vmem>>, vector<1x8x8xbf16>
    %117 = vector.shape_cast %116 : vector<1x8x8xbf16> to vector<8x8xbf16>
    %c0_98 = arith.constant 0 : index
    %c64 = arith.constant 64 : index
    %118 = vector.load %arg7[%c0_98, %c64] : memref<8x512xbf16, #tpu.memory_space<vmem>>, vector<8x384xbf16>
    %cst_99 = arith.constant dense<0.000000e+00> : vector<8x384xf32>
    %119 = tpu.matmul %117, %118, %cst_99 {dimension_numbers = #tpu.dot_dimension_numbers<[1], [0], [0], [1], [0, 0, 1, 1], [], []>} : vector<8x8xbf16>, vector<8x384xbf16>, vector<8x384xf32> -> vector<8x384xf32>
    %120 = arith.addf %115, %119 : vector<8x384xf32>
    %c20_100 = arith.constant 20 : index
    %c0_101 = arith.constant 0 : index
    %c0_102 = arith.constant 0 : index
    %121 = vector.load %arg3[%c20_100, %c0_101, %c0_102] : memref<25x8x8xbf16, #tpu.memory_space<vmem>>, vector<1x8x8xbf16>
    %122 = vector.shape_cast %121 : vector<1x8x8xbf16> to vector<8x8xbf16>
    %c0_103 = arith.constant 0 : index
    %c80 = arith.constant 80 : index
    %123 = vector.load %arg7[%c0_103, %c80] : memref<8x512xbf16, #tpu.memory_space<vmem>>, vector<8x384xbf16>
    %cst_104 = arith.constant dense<0.000000e+00> : vector<8x384xf32>
    %124 = tpu.matmul %122, %123, %cst_104 {dimension_numbers = #tpu.dot_dimension_numbers<[1], [0], [0], [1], [0, 0, 1, 1], [], []>} : vector<8x8xbf16>, vector<8x384xbf16>, vector<8x384xf32> -> vector<8x384xf32>
    %125 = arith.addf %120, %124 : vector<8x384xf32>
    %c21_105 = arith.constant 21 : index
    %c0_106 = arith.constant 0 : index
    %c0_107 = arith.constant 0 : index
    %126 = vector.load %arg3[%c21_105, %c0_106, %c0_107] : memref<25x8x8xbf16, #tpu.memory_space<vmem>>, vector<1x8x8xbf16>
    %127 = vector.shape_cast %126 : vector<1x8x8xbf16> to vector<8x8xbf16>
    %c0_108 = arith.constant 0 : index
    %c81 = arith.constant 81 : index
    %128 = vector.load %arg7[%c0_108, %c81] : memref<8x512xbf16, #tpu.memory_space<vmem>>, vector<8x384xbf16>
    %cst_109 = arith.constant dense<0.000000e+00> : vector<8x384xf32>
    %129 = tpu.matmul %127, %128, %cst_109 {dimension_numbers = #tpu.dot_dimension_numbers<[1], [0], [0], [1], [0, 0, 1, 1], [], []>} : vector<8x8xbf16>, vector<8x384xbf16>, vector<8x384xf32> -> vector<8x384xf32>
    %130 = arith.addf %125, %129 : vector<8x384xf32>
    %c22_110 = arith.constant 22 : index
    %c0_111 = arith.constant 0 : index
    %c0_112 = arith.constant 0 : index
    %131 = vector.load %arg3[%c22_110, %c0_111, %c0_112] : memref<25x8x8xbf16, #tpu.memory_space<vmem>>, vector<1x8x8xbf16>
    %132 = vector.shape_cast %131 : vector<1x8x8xbf16> to vector<8x8xbf16>
    %c0_113 = arith.constant 0 : index
    %c82 = arith.constant 82 : index
    %133 = vector.load %arg7[%c0_113, %c82] : memref<8x512xbf16, #tpu.memory_space<vmem>>, vector<8x384xbf16>
    %cst_114 = arith.constant dense<0.000000e+00> : vector<8x384xf32>
    %134 = tpu.matmul %132, %133, %cst_114 {dimension_numbers = #tpu.dot_dimension_numbers<[1], [0], [0], [1], [0, 0, 1, 1], [], []>} : vector<8x8xbf16>, vector<8x384xbf16>, vector<8x384xf32> -> vector<8x384xf32>
    %135 = arith.addf %130, %134 : vector<8x384xf32>
    %c23_115 = arith.constant 23 : index
    %c0_116 = arith.constant 0 : index
    %c0_117 = arith.constant 0 : index
    %136 = vector.load %arg3[%c23_115, %c0_116, %c0_117] : memref<25x8x8xbf16, #tpu.memory_space<vmem>>, vector<1x8x8xbf16>
    %137 = vector.shape_cast %136 : vector<1x8x8xbf16> to vector<8x8xbf16>
    %c0_118 = arith.constant 0 : index
    %c83 = arith.constant 83 : index
    %138 = vector.load %arg7[%c0_118, %c83] : memref<8x512xbf16, #tpu.memory_space<vmem>>, vector<8x384xbf16>
    %cst_119 = arith.constant dense<0.000000e+00> : vector<8x384xf32>
    %139 = tpu.matmul %137, %138, %cst_119 {dimension_numbers = #tpu.dot_dimension_numbers<[1], [0], [0], [1], [0, 0, 1, 1], [], []>} : vector<8x8xbf16>, vector<8x384xbf16>, vector<8x384xf32> -> vector<8x384xf32>
    %140 = arith.addf %135, %139 : vector<8x384xf32>
    %c24_120 = arith.constant 24 : index
    %c0_121 = arith.constant 0 : index
    %c0_122 = arith.constant 0 : index
    %141 = vector.load %arg3[%c24_120, %c0_121, %c0_122] : memref<25x8x8xbf16, #tpu.memory_space<vmem>>, vector<1x8x8xbf16>
    %142 = vector.shape_cast %141 : vector<1x8x8xbf16> to vector<8x8xbf16>
    %c0_123 = arith.constant 0 : index
    %c84 = arith.constant 84 : index
    %143 = vector.load %arg7[%c0_123, %c84] : memref<8x512xbf16, #tpu.memory_space<vmem>>, vector<8x384xbf16>
    %cst_124 = arith.constant dense<0.000000e+00> : vector<8x384xf32>
    %144 = tpu.matmul %142, %143, %cst_124 {dimension_numbers = #tpu.dot_dimension_numbers<[1], [0], [0], [1], [0, 0, 1, 1], [], []>} : vector<8x8xbf16>, vector<8x384xbf16>, vector<8x384xf32> -> vector<8x384xf32>
    %145 = arith.addf %140, %144 : vector<8x384xf32>
    %cst_125 = arith.constant 5.000000e-01 : f32
    %146 = vector.broadcast %cst_125 : f32 to vector<8x384xf32>
    %147 = arith.mulf %146, %145 : vector<8x384xf32>
    %cst_126 = arith.constant 0.707106769 : f32
    %148 = vector.broadcast %cst_126 : f32 to vector<8x384xf32>
    %149 = arith.mulf %145, %148 : vector<8x384xf32>
    %cst_127 = arith.constant -4.000000e+00 : f32
    %cst_128 = arith.constant 4.000000e+00 : f32
    %150 = vector.broadcast %cst_127 : f32 to vector<8x384xf32>
    %151 = arith.maximumf %150, %149 : vector<8x384xf32>
    %152 = vector.broadcast %cst_128 : f32 to vector<8x384xf32>
    %153 = arith.minimumf %152, %151 : vector<8x384xf32>
    %154 = arith.mulf %153, %153 : vector<8x384xf32>
    %cst_129 = arith.constant -2.72614237E-10 : f32
    %155 = vector.broadcast %cst_129 : f32 to vector<8x384xf32>
    %156 = arith.mulf %154, %155 : vector<8x384xf32>
    %cst_130 = arith.constant 2.77068146E-8 : f32
    %157 = vector.broadcast %cst_130 : f32 to vector<8x384xf32>
    %158 = arith.addf %156, %157 : vector<8x384xf32>
    %159 = arith.mulf %154, %158 : vector<8x384xf32>
    %cst_131 = arith.constant -2.10102394E-6 : f32
    %160 = vector.broadcast %cst_131 : f32 to vector<8x384xf32>
    %161 = arith.addf %159, %160 : vector<8x384xf32>
    %162 = arith.mulf %154, %161 : vector<8x384xf32>
    %cst_132 = arith.constant -5.69250624E-5 : f32
    %163 = vector.broadcast %cst_132 : f32 to vector<8x384xf32>
    %164 = arith.addf %162, %163 : vector<8x384xf32>
    %165 = arith.mulf %154, %164 : vector<8x384xf32>
    %cst_133 = arith.constant -7.34990637E-4 : f32
    %166 = vector.broadcast %cst_133 : f32 to vector<8x384xf32>
    %167 = arith.addf %165, %166 : vector<8x384xf32>
    %168 = arith.mulf %154, %167 : vector<8x384xf32>
    %cst_134 = arith.constant -2.954600e-03 : f32
    %169 = vector.broadcast %cst_134 : f32 to vector<8x384xf32>
    %170 = arith.addf %168, %169 : vector<8x384xf32>
    %171 = arith.mulf %154, %170 : vector<8x384xf32>
    %cst_135 = arith.constant -0.0160960332 : f32
    %172 = vector.broadcast %cst_135 : f32 to vector<8x384xf32>
    %173 = arith.addf %171, %172 : vector<8x384xf32>
    %174 = arith.mulf %153, %173 : vector<8x384xf32>
    %cst_136 = arith.constant -1.45660715E-5 : f32
    %175 = vector.broadcast %cst_136 : f32 to vector<8x384xf32>
    %176 = arith.mulf %154, %175 : vector<8x384xf32>
    %cst_137 = arith.constant -2.13374049E-4 : f32
    %177 = vector.broadcast %cst_137 : f32 to vector<8x384xf32>
    %178 = arith.addf %176, %177 : vector<8x384xf32>
    %179 = arith.mulf %154, %178 : vector<8x384xf32>
    %cst_138 = arith.constant -0.00168282702 : f32
    %180 = vector.broadcast %cst_138 : f32 to vector<8x384xf32>
    %181 = arith.addf %179, %180 : vector<8x384xf32>
    %182 = arith.mulf %154, %181 : vector<8x384xf32>
    %cst_139 = arith.constant -0.00737332925 : f32
    %183 = vector.broadcast %cst_139 : f32 to vector<8x384xf32>
    %184 = arith.addf %182, %183 : vector<8x384xf32>
    %185 = arith.mulf %154, %184 : vector<8x384xf32>
    %cst_140 = arith.constant -0.0142647391 : f32
    %186 = vector.broadcast %cst_140 : f32 to vector<8x384xf32>
    %187 = arith.addf %185, %186 : vector<8x384xf32>
    %cst_141 = arith.constant 0.000000e+00 : f32
    %188 = vector.broadcast %cst_141 : f32 to vector<8x384xf32>
    %189 = arith.subf %188, %174 : vector<8x384xf32>
    %cst_142 = arith.constant 0.000000e+00 : f32
    %190 = vector.broadcast %cst_142 : f32 to vector<8x384xf32>
    %191 = arith.subf %190, %187 : vector<8x384xf32>
    %192 = tpu.reciprocal %191 {approx = true} : vector<8x384xf32> -> vector<8x384xf32>
    %193 = arith.mulf %189, %192 : vector<8x384xf32>
    %cst_143 = arith.constant 1.000000e+00 : f32
    %194 = vector.broadcast %cst_143 : f32 to vector<8x384xf32>
    %195 = arith.addf %194, %193 : vector<8x384xf32>
    %196 = arith.mulf %147, %195 : vector<8x384xf32>
    %c0_144 = arith.constant 0 : index
    %c0_145 = arith.constant 0 : index
    %197 = vector.load %arg4[%c0_144, %c0_145] : memref<4x8xbf16, #tpu.memory_space<vmem>>, vector<4x8xbf16>
    %198 = arith.truncf %196 : vector<8x384xf32> to vector<8x384xbf16>
    %cst_146 = arith.constant dense<0.000000e+00> : vector<4x384xf32>
    %199 = tpu.matmul %197, %198, %cst_146 {dimension_numbers = #tpu.dot_dimension_numbers<[1], [0], [0], [1], [0, 0, 1, 1], [], []>} : vector<4x8xbf16>, vector<8x384xbf16>, vector<4x384xf32> -> vector<4x384xf32>
    %cst_147 = arith.constant 0.000000e+00 : f32
    %200 = vector.broadcast %cst_147 : f32 to vector<4x384xf32>
    %201 = arith.subf %200, %199 : vector<4x384xf32>
    %202 = math.exp %201 : vector<4x384xf32>
    %cst_148 = arith.constant 1.000000e+00 : f32
    %203 = vector.broadcast %cst_148 : f32 to vector<4x384xf32>
    %204 = arith.addf %203, %202 : vector<4x384xf32>
    %205 = tpu.reciprocal %204 {approx = true} : vector<4x384xf32> -> vector<4x384xf32>
    %c0_149 = arith.constant 0 : index
    %c0_150 = arith.constant 0 : index
    %c42_151 = arith.constant 42 : index
    %206 = vector.load %arg6[%c0_149, %c0_150, %c42_151] : memref<1x8x512xf32, #tpu.memory_space<vmem>>, vector<1x4x384xf32>
    %207 = vector.shape_cast %206 : vector<1x4x384xf32> to vector<4x384xf32>
    %208 = arith.mulf %207, %205 : vector<4x384xf32>
    %c0_152 = arith.constant 0 : index
    %c0_153 = arith.constant 0 : index
    %c0_154 = arith.constant 0 : index
    %209 = vector.load %arg5[%c0_152, %c0_153, %c0_154] : memref<1x4x384xf32, #tpu.memory_space<vmem>>, vector<1x4x384xf32>
    %210 = vector.shape_cast %209 : vector<1x4x384xf32> to vector<4x384xf32>
    %211 = vector.shape_cast %208 : vector<4x384xf32> to vector<1x4x384xf32>
    tpu.vector_store %arg5[%c0_152, %c0_153, %c0_154], %211 {strides = array<i32>} : memref<1x4x384xf32, #tpu.memory_space<vmem>>, vector<1x4x384xf32>,
    return
  }
  func.func @transform_1(%arg0: i32, %arg1: i32) -> (i32, i32, i32) {
    %c0_i32 = arith.constant 0 : i32
    %c0_i32_0 = arith.constant 0 : i32
    %c0_i32_1 = arith.constant 0 : i32
    %c0_i32_2 = arith.constant 0 : i32
    return %c0_i32, %c0_i32_0, %c0_i32_1 : i32, i32, i32
  }
  func.func @transform_2(%arg0: i32, %arg1: i32) -> (i32, i32) {
    %c0_i32 = arith.constant 0 : i32
    %c0_i32_0 = arith.constant 0 : i32
    %c0_i32_1 = arith.constant 0 : i32
    return %c0_i32, %c0_i32_0 : i32, i32
  }
  func.func @transform_3(%arg0: i32, %arg1: i32) -> (i32, i32, i32) {
    %c0_i32 = arith.constant 0 : i32
    %c0_i32_0 = arith.constant 0 : i32
    return %arg0, %c0_i32, %arg1 : i32, i32, i32
  }
}

</mosaic_0001>

<bundles_post_ra>
// kernel: tpu_custom_call.1
= control target key start
LH: loop header
LB: loop body
LE: loop exit
PB: predicated region body
PF: predicated region fallthrough
CT: control target
= control target key end

     0   :  { %8 = vsyncpa [#allocation6], 0  ;;  %s3109_s0 = inlined_call_operand.vmem [shape: f32[2,8,520], index: 0, kind: input, shape index: {}]   ;;  %s3110_s1 = inlined_call_operand.vmem [shape: bf16[25,8,8], index: 1, kind: input, shape index: {}]   ;;  %s3111_s2 = inlined_call_operand.vmem [shape: bf16[4,8], index: 2, kind: input, shape index: {}]   ;;  %s3112_s3 = inlined_call_operand.hbm [shape: f32[2,4,384], index: 3, kind: output, shape index: {}]  }
   0x1   :  { %10 = vsyncpa [#allocation6 + $0x1], 0  ;;  %s2532_s12 = smov 0   ;;  %s2534_s13 = smov 0  }
   0x2   :  { %s2536_s14 = smov 0   ;;  %s2538_s15 = smov 0  }
   0x3   :  { %s2540_s16 = smov 0   ;;  %s2542_s17 = smov 0  }
   0x4 LB: > { %s2190_s18 = sadd.s32 4294967295, %s2485_s17   ;;  %s2191_s19 = sadd.s32 4294967294, %s2485_s17   ;;  %s2485_s17 = sphi %s2542_s17, %s16_s17   ;;  %s2481_s16 = sphi %s2540_s16, %s3119_s16   ;;  %s2477_s15 = sphi %s2538_s15, %s3118_s15   ;;  %s2473_s14 = sphi %s2536_s14, %s3117_s14   ;;  %s2469_s13 = sphi %s2534_s13, %s3116_s13   ;;  %s2465_s12 = sphi %s2532_s12, %s3115_s12  }
   0x5   : > { %s28_s20 = sadd.s32 1, %s2481_s16  ;;  %s79_s21 = sadd.s32 1, %s2473_s14 }
   0x6   : > { %p30_p0 = scmp.ge.s32.totalorder %s28_s20, 2  ;;  %p89_p1 = scmp.ne.s32.totalorder %s2473_s14, %s2469_s13 }
   0x7   : > { %p90_p2 = scmp.eq.s32.totalorder %s2190_s18, 1  ;;  %p95_p3 = scmp.ne.s32.totalorder %s2469_s13, %s2465_s12 }
   0x8   : > { %s3121_s20 = smov (%p30_p0, %s28_s20), 0  ;;  %p96_p5 = scmp.eq.s32.totalorder %s2191_s19, 1 }
   0x9   : > { %p2572_p4 = por %p90_p2, %p89_p1  ;;  %s74_s23 = ssub.s32 %s2481_s16, %s3121_s20 }
   0xa   : > { %p2193_p6 = scmp.ge.s32.totalorder %s2485_s17, 1  ;;  %p77_p7 = scmp.eq.s32.totalorder %s74_s23, 0 }
   0xb   : > { %p2579_p8 = por %p96_p5, %p95_p3  ;;  %p120_p9 = scmp.lt.s32.totalorder %s2485_s17, 3 }
   0xc   : > { %s2585_s25 = scalar_select %p77_p7, %s2473_s14, %s79_s21  }
   0xd   : > { %p121_p10 = pnand %p2193_p6, %p120_p9 }
   0xe   : > { %s134_s26 = sand.u32 (!%p121_p10), 1, %s2469_s13   ;;  %s2304_s27 = smul.u32 (!%p121_p10), 40, %s2477_s15 }
   0xf   : > { %124 = sbr.rel (%p121_p10) target bundleno = 1024 (0x400), region = 28 }
  0x10   : > { %s2305_s28 = smul.u32 (!%p121_p10), 12, %s134_s26  ;;  %s145_s4 = scalar_lea.vmem (!%p121_p10), %s3109_s0, %s2304_s27 }
  0x12   : > { %s2594_s5 = scalar_lea.vmem (!%p121_p10), [#allocation5], %s2305_s28 }
  0x14   : > { %v156_v0 = vld [vmem:[%s145_s4] sm:$0xff]  ;;  %v158_v1 = vld [vmem:[%s145_s4 + $0x8] sm:$0xff]  ;;  %v160_v2 = vld [vmem:[%s145_s4 + $0x10] sm:$0xff] }
  0x15   : > { %157 = vst [vmem:[#allocation2 + $0x10] sm:$0xff] %v156_v0  ;;  %v162_v3 = vld [vmem:[%s145_s4 + $0x18] sm:$0xff] }
  0x16   : > { %159 = vst [vmem:[#allocation2] sm:$0xff] %v158_v1 }
  0x17   : > { %161 = vst [vmem:[#allocation2 + $0x18] sm:$0xff] %v160_v2 }
  0x18   : > { %163 = vst [vmem:[#allocation2 + $0x8] sm:$0xff] %v162_v3 }
  0x19   : > { %169 = vsyncadd [#allocation4], 512 }
  0x1a   : > { %2457 = dma.done.wait [#allocation4], 512 }
  0x1b   : > { %2458 = vsyncadd [#allocation4], 4294966784  ;;  %s2487_s6 = smov 127   ;;  %s2488_s7 = smov 126   ;;  %vm215_vm0 = vcmask 1043456   ;;  %vm211_vm1 = vcmask 64512  }
  0x1c   : > { %v174_v6 = vld [vmem:[#allocation2 + $0x10] sm:$0xff]  ;;  %s2489_s8 = smov 125   ;;  %s2490_s9 = smov 124   ;;  %v2645_v19 = vld [vmem:[%s3110_s1] sm:$0xf]  ;;  %vm207_vm2 = vcmask 1039360  }
  0x1d   : > { %v175_v8 = vld [vmem:[#allocation2] sm:$0xff]  ;;  %s2491_s10 = smov 108   ;;  %s2492_s11 = smov 107   ;;  %vm333_vm3 = vcmask 1031168   ;;  %v2202_v49 = vld [vmem:[%s3110_s1 + $0x8] sm:$0xf] }
  0x1e   : > { %v176_v4 = vld [vmem:[#allocation2 + $0x18] sm:$0xff]  ;;  %v178_v9 = vpack.c.bf16 %v175_v8, %v174_v6  ;;  %s2493_s18 = smov 106   ;;  %s2494_s19 = smov 105   ;;  %v2195_v40 = vld [vmem:[%s3110_s1 + $0x4] sm:$0xf]  ;;  %vm401_vm4 = vcmask 1022976  }
  0x1f   : > { %v177_v5 = vld [vmem:[#allocation2 + $0x8] sm:$0xff]  ;;  %s2495_s21 = smov 104   ;;  %s2496_s23 = smov 88   ;;  %vm469_vm5 = vcmask 1014784   ;;  %vm537_vm6 = vcmask 883712   ;;  %vm605_vm7 = vcmask 875520  }
  0x20   : > { %v179_v7 = vpack.c.bf16 %v177_v5, %v176_v4  ;;  %v191_v11 = vunpack.c.l.b16 %v178_v9  ;;  %v192_v15 = vunpack.c.h.b16 %v178_v9  ;;  %s2497_s29 = smov 87   ;;  %s2498_s30 = smov 86   ;;  %v2206_v2 = vld [vmem:[%s3110_s1 + $0xc] sm:$0xf]  ;;  %vm673_vm8 = vcmask 867328  }
  0x21   : > { %s2503_s28 = smov 66   ;;  %vm741_vm9 = vcmask 859136   ;;  %vm809_vm10 = vcmask 850944   ;;  %vm877_vm11 = vcmask 719872   ;;  %vm945_vm12 = vcmask 711680   ;;  %s2508_s27 = smov 46  }
  0x22   : > { %181 = vst [vmem:[#allocation3 + $0x8] sm:$0xff] %v179_v7  ;;  %v193_v10 = vunpack.c.l.b16 %v179_v7  ;;  %v2598_v13 = vpack.c.b16 %v191_v11, %v191_v11  ;;  %v194_v14 = vunpack.c.h.b16 %v179_v7  ;;  %v2605_v17 = vpack.c.b16 %v192_v15, %v192_v15 }
  0x23   : > { %vm1013_vm13 = vcmask 703488   ;;  %vm1081_vm14 = vcmask 695296   ;;  %vm1149_vm15 = vcmask 687104  }
  0x24   : > { %v2596_v12 = vpack.c.b16 %v193_v10, %v193_v10  ;;  %199 = vrot.lane.b32.xlu0 %v2598_v13, %s2487_s6  ;;  %325 = vrot.lane.b32.xlu2 %v2598_v13, %s2488_s7  ;;  %v2603_v16 = vpack.c.b16 %v194_v14, %v194_v14  ;;  %v276_v18 = vsel %vm215_vm0, %v2598_v13, 0  ;;  %v279_v32 = vsel %vm215_vm0, %v2605_v17, 0 }
  0x25   : > { %291 = vmatpush.bf16.msra.mxu3 %v276_v18 }
  0x26   : > { %203 = vrot.lane.b32.xlu1 %v2596_v12, %s2487_s6 }
  0x28   : > { %2199 = vmatmul.msk.bf16.vlgmr.msra.gmra.mxu3 %vm211_vm1, %v2645_v19 }
  0x29   : > { %v184_v23 = vld [vmem:[#allocation3 + $0x8] sm:$0xf] }
  0x2a   : > { %v268_v26 = vunpack.c.l.b16 %v184_v23 }
  0x2c   : > { %201 = vrot.lane.b32.xlu0 %v2605_v17, %s2487_s6  ;;  %327 = vrot.lane.b32.xlu2 %v2605_v17, %s2488_s7  ;;  %v271_v28 = vpack.c.b16 %v268_v26, %v268_v26 }
  0x2e   : > { %205 = vrot.lane.b32.xlu1 %v2603_v16, %s2487_s6  ;;  %v282_v37 = vsel %vm215_vm0, %v271_v28, 0  ;;  %v2210_v28 = vld [vmem:[%s3110_s1 + $0x10] sm:$0xf]  ;;  %s2504_s6 = smov 65  }
  0x34   : > { %329 = vrot.lane.b32.xlu0 %v2596_v12, %s2488_s7  ;;  %395 = vrot.lane.b32.xlu2 %v2605_v17, %s2489_s8 }
  0x36   : > { %331 = vrot.lane.b32.xlu1 %v2603_v16, %s2488_s7  ;;  %s2499_s7 = smov 85  }
  0x3c   : > { %397 = vrot.lane.b32.xlu0 %v2596_v12, %s2489_s8  ;;  %399 = vrot.lane.b32.xlu2 %v2603_v16, %s2489_s8 }
  0x3e   : > { %393 = vrot.lane.b32.xlu1 %v2598_v13, %s2489_s8  ;;  %s2510_s8 = smov 44  }
  0x44   : > { %461 = vrot.lane.b32.xlu0 %v2598_v13, %s2490_s9  ;;  %465 = vrot.lane.b32.xlu2 %v2596_v12, %s2490_s9 }
  0x46   : > { %463 = vrot.lane.b32.xlu1 %v2605_v17, %s2490_s9 }
  0x4c   : > { %467 = vrot.lane.b32.xlu0 %v2603_v16, %s2490_s9  ;;  %531 = vrot.lane.b32.xlu2 %v2605_v17, %s2491_s10  ;;  %s2505_s9 = smov 64  }
  0x4e   : > { %529 = vrot.lane.b32.xlu1 %v2598_v13, %s2491_s10 }
  0x54   : > { %533 = vrot.lane.b32.xlu0 %v2596_v12, %s2491_s10  ;;  %599 = vrot.lane.b32.xlu2 %v2605_v17, %s2492_s11 }
  0x56   : > { %597 = vrot.lane.b32.xlu1 %v2598_v13, %s2492_s11 }
  0x5c   : > { %535 = vrot.lane.b32.xlu0 %v2603_v16, %s2491_s10  ;;  %603 = vrot.lane.b32.xlu2 %v2603_v16, %s2492_s11  ;;  %s2500_s10 = smov 84  }
  0x5e   : > { %601 = vrot.lane.b32.xlu1 %v2596_v12, %s2492_s11  ;;  %s2501_s11 = smov 68  }
  0x64   : > { %667 = vrot.lane.b32.xlu0 %v2605_v17, %s2493_s18  ;;  %665 = vrot.lane.b32.xlu2 %v2598_v13, %s2493_s18 }
  0x66   : > { %669 = vrot.lane.b32.xlu1 %v2596_v12, %s2493_s18 }
  0x6c   : > { %671 = vrot.lane.b32.xlu0 %v2603_v16, %s2493_s18  ;;  %735 = vrot.lane.b32.xlu2 %v2605_v17, %s2494_s19  ;;  %s2506_s18 = smov 48  }
  0x6e   : > { %733 = vrot.lane.b32.xlu1 %v2598_v13, %s2494_s19 }
  0x74   : > { %737 = vrot.lane.b32.xlu0 %v2596_v12, %s2494_s19  ;;  %801 = vrot.lane.b32.xlu2 %v2598_v13, %s2495_s21 }
  0x76   : > { %739 = vrot.lane.b32.xlu1 %v2603_v16, %s2494_s19  ;;  %s2507_s19 = smov 47  }
  0x7c   : > { %803 = vrot.lane.b32.xlu0 %v2605_v17, %s2495_s21  ;;  %869 = vrot.lane.b32.xlu2 %v2598_v13, %s2496_s23 }
  0x7e   : > { %805 = vrot.lane.b32.xlu1 %v2596_v12, %s2495_s21  ;;  %v326_v20 = vpop.permute.xlu2 %325 }
  0x84   : > { %871 = vrot.lane.b32.xlu0 %v2605_v17, %s2496_s23  ;;  %873 = vrot.lane.b32.xlu2 %v2596_v12, %s2496_s23 }
  0x86   : > { %807 = vrot.lane.b32.xlu1 %v2603_v16, %s2495_s21  ;;  %v328_v21 = vpop.permute.xlu2 %327  ;;  %s2502_s21 = smov 67  }
  0x87   : > { %v334_v33 = vsel %vm333_vm3, %v326_v20, %v328_v21 }
  0x88   : > { %v341_v41 = vsel %vm215_vm0, %v334_v33, 0 }
  0x8c   : > { %875 = vrot.lane.b32.xlu0 %v2603_v16, %s2496_s23  ;;  %941 = vrot.lane.b32.xlu2 %v2596_v12, %s2497_s29 }
  0x8e   : > { %939 = vrot.lane.b32.xlu1 %v2605_v17, %s2497_s29  ;;  %v2655_v22 = vpop.permute.xlu2 %395 }
  0x94   : > { %937 = vrot.lane.b32.xlu0 %v2598_v13, %s2497_s29  ;;  %1005 = vrot.lane.b32.xlu2 %v2598_v13, %s2498_s30 }
  0x96   : > { %943 = vrot.lane.b32.xlu1 %v2603_v16, %s2497_s29  ;;  %v200_v25 = vpop.permute.xlu0 %199  ;;  %v400_v27 = vpop.permute.xlu2 %399 }
  0x98   : > { %v204_v24 = vpop.permute.xlu1 %203 }
  0x9c   : > { %1007 = vrot.lane.b32.xlu0 %v2605_v17, %s2498_s30  ;;  %1011 = vrot.lane.b32.xlu2 %v2603_v16, %s2498_s30 }
  0x9e   : > { %1009 = vrot.lane.b32.xlu1 %v2596_v12, %s2498_s30  ;;  %v202_v30 = vpop.permute.xlu0 %201  ;;  %v2678_v42 = vpop.permute.xlu2 %465 }
  0x9f   : > { %v208_v34 = vsel %vm207_vm2, %v200_v25, %v202_v30  ;;  %v209_v35 = vsel %vm207_vm2, %v202_v30, %v204_v24 }
  0xa0   : > { %v206_v29 = vpop.permute.xlu1 %205  ;;  %v217_v38 = vsel %vm215_vm0, %v208_v34, 0  ;;  %v220_v39 = vsel %vm215_vm0, %v209_v35, 0 }
  0xa1   : > { %v210_v31 = vsel %vm207_vm2, %v204_v24, %v206_v29  ;;  %232 = vmatpush.bf16.msra.mxu0 %v217_v38  ;;  %245 = vmatpush.bf16.msra.mxu1 %v220_v39  ;;  %v2218_v38 = vld [vmem:[%s3110_s1 + $0x18] sm:$0xf]  ;;  %vm1217_vm2 = vcmask 556032  }
  0xa2   : > { %v223_v36 = vsel %vm215_vm0, %v210_v31, 0 }
  0xa3   : > { %258 = vmatpush.bf16.msra.mxu2 %v223_v36 }
  0xa4   : > { %2196 = vmatmul.msk.bf16.vlgmr.msra.gmra.mxu0 %vm211_vm1, %v2195_v40  ;;  %2197 = vmatmul.msk.bf16.vlgmr.msra.gmra.mxu1 %vm211_vm1, %v2195_v40 }
  0xa5   : > { %304 = vmatpush.bf16.msrb.mxu0 %v279_v32  ;;  %317 = vmatpush.bf16.msrb.mxu1 %v282_v37 }
  0xa6   : > { %2198 = vmatmul.msk.bf16.vlgmr.msra.gmra.mxu2 %vm211_vm1, %v2195_v40  ;;  %1075 = vrot.lane.b32.xlu1 %v2605_v17, %s2499_s7  ;;  %v330_v44 = vpop.permute.xlu0 %329  ;;  %v532_v50 = vpop.permute.xlu2 %531 }
  0xa7   : > { %356 = vmatpush.bf16.msrb.mxu2 %v341_v41  ;;  %1073 = vrot.lane.b32.xlu0 %v2598_v13, %s2499_s7  ;;  %v335_v45 = vsel %vm333_vm3, %v328_v21, %v330_v44  ;;  %v2214_v21 = vld [vmem:[%s3110_s1 + $0x14] sm:$0xf] }
  0xa8   : > { %v332_v43 = vpop.permute.xlu1 %331  ;;  %1077 = vrot.lane.b32.xlu2 %v2596_v12, %s2499_s7  ;;  %v344_v47 = vsel %vm215_vm0, %v335_v45, 0 }
  0xa9   : > { %v336_v46 = vsel %vm333_vm3, %v330_v44, %v332_v43  ;;  %369 = vmatpush.bf16.msrb.mxu3 %v344_v47  ;;  %vm1353_vm3 = vcmask 539648  }
  0xaa   : > { %v347_v48 = vsel %vm215_vm0, %v336_v46, 0 }
  0xab   : > { %382 = vmatpush.bf16.msra.mxu0 %v347_v48 }
  0xac   : > { %2204 = vmatmul.msk.bf16.vlgmr.msrb.gmra.mxu3 %vm211_vm1, %v2202_v49 }
  0xae   : > { %1143 = vrot.lane.b32.xlu1 %v2605_v17, %s2500_s10  ;;  %v398_v53 = vpop.permute.xlu0 %397  ;;  %v600_v59 = vpop.permute.xlu2 %599 }
  0xaf   : > { %1141 = vrot.lane.b32.xlu0 %v2598_v13, %s2500_s10  ;;  %v403_v55 = vsel %vm401_vm4, %v2655_v22, %v398_v53  ;;  %v404_v56 = vsel %vm401_vm4, %v398_v53, %v400_v27  ;;  %v2222_v53 = vld [vmem:[%s3110_s1 + $0x1c] sm:$0xf] }
  0xb0   : > { %v394_v51 = vpop.permute.xlu1 %393  ;;  %1079 = vrot.lane.b32.xlu2 %v2603_v16, %s2499_s7  ;;  %v412_v57 = vsel %vm215_vm0, %v403_v55, 0  ;;  %v415_v58 = vsel %vm215_vm0, %v404_v56, 0  ;;  %s2509_s7 = smov 45  }
  0xb1   : > { %v402_v52 = vsel %vm401_vm4, %v394_v51, %v2655_v22  ;;  %450 = vmatpush.bf16.msra.mxu3 %v415_v58  ;;  %437 = vmatpush.bf16.msra.mxu2 %v412_v57  ;;  %vm1285_vm4 = vcmask 547840  }
  0xb2   : > { %v409_v54 = vsel %vm215_vm0, %v402_v52, 0 }
  0xb3   : > { %424 = vmatpush.bf16.msra.mxu1 %v409_v54 }
  0xb4   : > { %2200 = vmatmul.msk.bf16.vlgmr.msrb.gmra.mxu0 %vm211_vm1, %v2645_v19  ;;  %2201 = vmatmul.msk.bf16.vlgmr.msrb.gmra.mxu1 %vm211_vm1, %v2645_v19 }
  0xb6   : > { %2203 = vmatmul.msk.bf16.vlgmr.msrb.gmra.mxu2 %vm211_vm1, %v2202_v49  ;;  %1147 = vrot.lane.b32.xlu1 %v2603_v16, %s2500_s10  ;;  %v462_v62 = vpop.permute.xlu0 %461  ;;  %v604_v6 = vpop.permute.xlu2 %603 }
  0xb7   : > { %1145 = vrot.lane.b32.xlu0 %v2596_v12, %s2500_s10 }
  0xb8   : > { %v464_v60 = vpop.permute.xlu1 %463  ;;  %1211 = vrot.lane.b32.xlu2 %v2605_v17, %s2501_s11 }
  0xb9   : > { %v471_v61 = vsel %vm469_vm5, %v464_v60, %v2678_v42  ;;  %v470_v0 = vsel %vm469_vm5, %v462_v62, %v464_v60 }
  0xba   : > { %v480_v63 = vsel %vm215_vm0, %v471_v61, 0  ;;  %v477_v1 = vsel %vm215_vm0, %v470_v0, 0 }
  0xbb   : > { %505 = vmatpush.bf16.msrb.mxu1 %v480_v63  ;;  %492 = vmatpush.bf16.msrb.mxu0 %v477_v1 }
  0xbc   : > { %2209 = vmatmul.msk.bf16.vlgmr.msra.gmra.mxu3 %vm211_vm1, %v2206_v2 }
  0xbe   : > { %1209 = vrot.lane.b32.xlu1 %v2598_v13, %s2501_s11  ;;  %v468_v5 = vpop.permute.xlu0 %467  ;;  %v666_v20 = vpop.permute.xlu2 %665 }
  0xbf   : > { %1213 = vrot.lane.b32.xlu0 %v2596_v12, %s2501_s11  ;;  %v472_v8 = vsel %vm469_vm5, %v2678_v42, %v468_v5  ;;  %vm1421_vm5 = vcmask 531456  }
  0xc0   : > { %v530_v3 = vpop.permute.xlu1 %529  ;;  %1215 = vrot.lane.b32.xlu2 %v2603_v16, %s2501_s11  ;;  %v483_v9 = vsel %vm215_vm0, %v472_v8, 0  ;;  %s2511_s11 = smov 42  }
  0xc1   : > { %v538_v4 = vsel %vm537_vm6, %v530_v3, %v532_v50  ;;  %518 = vmatpush.bf16.msrb.mxu2 %v483_v9 }
  0xc2   : > { %v545_v7 = vsel %vm215_vm0, %v538_v4, 0 }
  0xc3   : > { %560 = vmatpush.bf16.msrb.mxu3 %v545_v7 }
  0xc4   : > { %2205 = vmatmul.msk.bf16.vlgmr.msra.gmra.mxu0 %vm211_vm1, %v2202_v49  ;;  %2207 = vmatmul.msk.bf16.vlgmr.msra.gmra.mxu1 %vm211_vm1, %v2206_v2 }
  0xc6   : > { %2208 = vmatmul.msk.bf16.vlgmr.msra.gmra.mxu2 %vm211_vm1, %v2206_v2  ;;  %1279 = vrot.lane.b32.xlu1 %v2605_v17, %s2502_s21  ;;  %v534_v11 = vpop.permute.xlu0 %533  ;;  %v736_v31 = vpop.permute.xlu2 %735 }
  0xc7   : > { %1277 = vrot.lane.b32.xlu0 %v2598_v13, %s2502_s21  ;;  %v539_v15 = vsel %vm537_vm6, %v532_v50, %v534_v11 }
  0xc8   : > { %v598_v10 = vpop.permute.xlu1 %597  ;;  %1281 = vrot.lane.b32.xlu2 %v2596_v12, %s2502_s21  ;;  %v548_v19 = vsel %vm215_vm0, %v539_v15, 0 }
  0xc9   : > { %v606_v14 = vsel %vm605_vm7, %v598_v10, %v600_v59  ;;  %573 = vmatpush.bf16.msra.mxu0 %v548_v19 }
  0xca   : > { %v613_v18 = vsel %vm215_vm0, %v606_v14, 0  ;;  %v2824_v14 = vpop.f32.mrf.mxu3 }
  0xcb   : > { %628 = vmatpush.bf16.msra.mxu2 %v613_v18 }
  0xcc   : > { %2215 = vmatmul.msk.bf16.vlgmr.msrb.gmra.mxu3 %vm211_vm1, %v2214_v21 }
  0xce   : > { %1345 = vrot.lane.b32.xlu1 %v2598_v13, %s2503_s28  ;;  %v536_v24 = vpop.permute.xlu0 %535  ;;  %v802_v39 = vpop.permute.xlu2 %801 }
  0xcf   : > { %1283 = vrot.lane.b32.xlu0 %v2603_v16, %s2502_s21  ;;  %v540_v26 = vsel %vm537_vm6, %v534_v11, %v536_v24  ;;  %v2226_v11 = vld [vmem:[%s3110_s1 + $0x20] sm:$0xf]  ;;  %vm1489_vm6 = vcmask 523264  }
  0xd0   : > { %v602_v22 = vpop.permute.xlu1 %601  ;;  %1347 = vrot.lane.b32.xlu2 %v2605_v17, %s2503_s28  ;;  %v551_v29 = vsel %vm215_vm0, %v540_v26, 0  ;;  %v2234_v26 = vld [vmem:[%s3110_s1 + $0x28] sm:$0xf] }
  0xd1   : > { %v607_v23 = vsel %vm605_vm7, %v600_v59, %v602_v22  ;;  %v608_v27 = vsel %vm605_vm7, %v602_v22, %v604_v6  ;;  %586 = vmatpush.bf16.msra.mxu1 %v551_v29  ;;  %v2230_v6 = vld [vmem:[%s3110_s1 + $0x24] sm:$0xf]  ;;  %vm1557_vm7 = vcmask 392192  }
  0xd2   : > { %v616_v25 = vsel %vm215_vm0, %v607_v23, 0  ;;  %v619_v30 = vsel %vm215_vm0, %v608_v27, 0  ;;  %v295_v27 = vpop.f32.mrf.mxu3 }
  0xd3   : > { %641 = vmatpush.bf16.msra.mxu3 %v616_v25  ;;  %v2250_v27 = vld [vmem:[%s3110_s1 + $0x38] sm:$0xf] }
  0xd4   : > { %2211 = vmatmul.msk.bf16.vlgmr.msrb.gmra.mxu0 %vm211_vm1, %v2210_v28  ;;  %2212 = vmatmul.msk.bf16.vlgmr.msrb.gmra.mxu1 %vm211_vm1, %v2210_v28 }
  0xd5   : > { %654 = vmatpush.bf16.msrb.mxu0 %v619_v30 }
  0xd6   : > { %2213 = vmatmul.msk.bf16.vlgmr.msrb.gmra.mxu2 %vm211_vm1, %v2210_v28  ;;  %1413 = vrot.lane.b32.xlu1 %v2598_v13, %s2504_s6  ;;  %v668_v33 = vpop.permute.xlu0 %667  ;;  %v870_v48 = vpop.permute.xlu2 %869 }
  0xd7   : > { %1349 = vrot.lane.b32.xlu0 %v2596_v12, %s2503_s28  ;;  %v674_v35 = vsel %vm673_vm8, %v666_v20, %v668_v33 }
  0xd8   : > { %v670_v32 = vpop.permute.xlu1 %669  ;;  %1415 = vrot.lane.b32.xlu2 %v2605_v17, %s2504_s6  ;;  %v681_v37 = vsel %vm215_vm0, %v674_v35, 0 }
  0xd9   : > { %v675_v34 = vsel %vm673_vm8, %v668_v33, %v670_v32  ;;  %696 = vmatpush.bf16.msrb.mxu1 %v681_v37 }
  0xda   : > { %v684_v36 = vsel %vm215_vm0, %v675_v34, 0 }
  0xdb   : > { %709 = vmatpush.bf16.msrb.mxu2 %v684_v36 }
  0xdc   : > { %2220 = vmatmul.msk.bf16.vlgmr.msra.gmra.mxu3 %vm211_vm1, %v2218_v38 }
  0xde   : > { %1417 = vrot.lane.b32.xlu1 %v2596_v12, %s2504_s6  ;;  %v672_v41 = vpop.permute.xlu0 %671  ;;  %v874_v59 = vpop.permute.xlu2 %873 }
  0xdf   : > { %1351 = vrot.lane.b32.xlu0 %v2603_v16, %s2503_s28  ;;  %v676_v42 = vsel %vm673_vm8, %v670_v32, %v672_v41  ;;  %v2238_v41 = vld [vmem:[%s3110_s1 + $0x2c] sm:$0xf]  ;;  %vm1625_vm8 = vcmask 384000  }
  0xe0   : > { %v734_v40 = vpop.permute.xlu1 %733  ;;  %1419 = vrot.lane.b32.xlu2 %v2603_v16, %s2504_s6  ;;  %v687_v44 = vsel %vm215_vm0, %v676_v42, 0 }
  0xe1   : > { %v742_v43 = vsel %vm741_vm9, %v734_v40, %v736_v31  ;;  %722 = vmatpush.bf16.msrb.mxu3 %v687_v44 }
  0xe2   : > { %v749_v45 = vsel %vm215_vm0, %v742_v43, 0 }
  0xe4   : > { %2216 = vmatmul.msk.bf16.vlgmr.msra.gmra.mxu0 %vm211_vm1, %v2214_v21  ;;  %2217 = vmatmul.msk.bf16.vlgmr.msra.gmra.mxu1 %vm211_vm1, %v2214_v21 }
  0xe5   : > { %764 = vmatpush.bf16.msra.mxu0 %v749_v45 }
  0xe6   : > { %2219 = vmatmul.msk.bf16.vlgmr.msra.gmra.mxu2 %vm211_vm1, %v2218_v38  ;;  %1485 = vrot.lane.b32.xlu1 %v2596_v12, %s2505_s9  ;;  %v738_v47 = vpop.permute.xlu0 %737  ;;  %v942_v5 = vpop.permute.xlu2 %941 }
  0xe7   : > { %1483 = vrot.lane.b32.xlu0 %v2605_v17, %s2505_s9  ;;  %v743_v49 = vsel %vm741_vm9, %v736_v31, %v738_v47 }
  0xe8   : > { %v740_v46 = vpop.permute.xlu1 %739  ;;  %1481 = vrot.lane.b32.xlu2 %v2598_v13, %s2505_s9  ;;  %v752_v51 = vsel %vm215_vm0, %v743_v49, 0 }
  0xe9   : > { %v744_v50 = vsel %vm741_vm9, %v738_v47, %v740_v46  ;;  %777 = vmatpush.bf16.msra.mxu1 %v752_v51  ;;  %vm1693_vm9 = vcmask 375808  }
  0xea   : > { %v755_v52 = vsel %vm215_vm0, %v744_v50, 0 }
  0xeb   : > { %790 = vmatpush.bf16.msra.mxu2 %v755_v52 }
  0xec   : > { %2225 = vmatmul.msk.bf16.vlgmr.msrb.gmra.mxu3 %vm211_vm1, %v2222_v53 }
  0xee   : > { %1549 = vrot.lane.b32.xlu1 %v2598_v13, %s2506_s18  ;;  %v804_v55 = vpop.permute.xlu0 %803  ;;  %v1006_v19 = vpop.permute.xlu2 %1005 }
  0xef   : > { %1487 = vrot.lane.b32.xlu0 %v2603_v16, %s2505_s9  ;;  %v810_v56 = vsel %vm809_vm10, %v802_v39, %v804_v55 }
  0xf0   : > { %v806_v54 = vpop.permute.xlu1 %805  ;;  %1551 = vrot.lane.b32.xlu2 %v2605_v17, %s2506_s18  ;;  %v817_v58 = vsel %vm215_vm0, %v810_v56, 0 }
  0xf1   : > { %v811_v57 = vsel %vm809_vm10, %v804_v55, %v806_v54  ;;  %832 = vmatpush.bf16.msra.mxu3 %v817_v58  ;;  %v2883_v58 = vld [vmem:[%s3110_s1 + $0x34] sm:$0xf] }
  0xf2   : > { %v820_v60 = vsel %vm215_vm0, %v811_v57, 0 }
  0xf4   : > { %2221 = vmatmul.msk.bf16.vlgmr.msrb.gmra.mxu0 %vm211_vm1, %v2218_v38  ;;  %2223 = vmatmul.msk.bf16.vlgmr.msrb.gmra.mxu1 %vm211_vm1, %v2222_v53 }
  0xf5   : > { %845 = vmatpush.bf16.msrb.mxu0 %v820_v60 }
  0xf6   : > { %2224 = vmatmul.msk.bf16.vlgmr.msrb.gmra.mxu2 %vm211_vm1, %v2222_v53  ;;  %1555 = vrot.lane.b32.xlu1 %v2603_v16, %s2506_s18  ;;  %v872_v63 = vpop.permute.xlu0 %871  ;;  %v1012_v28 = vpop.permute.xlu2 %1011 }
  0xf7   : > { %1553 = vrot.lane.b32.xlu0 %v2596_v12, %s2506_s18  ;;  %v878_v1 = vsel %vm877_vm11, %v870_v48, %v872_v63  ;;  %v879_v2 = vsel %vm877_vm11, %v872_v63, %v874_v59  ;;  %s2306_s18 = smul.u32 12, %s2477_s15  ;;  %s2100_s15 = scalar_lea.sflag [#allocation6], %s134_s26 }
  0xf8   : > { %v808_v61 = vpop.permute.xlu1 %807  ;;  %1617 = vrot.lane.b32.xlu2 %v2598_v13, %s2507_s19  ;;  %v885_v3 = vsel %vm215_vm0, %v878_v1, 0  ;;  %v888_v4 = vsel %vm215_vm0, %v879_v2, 0 }
  0xf9   : > { %v812_v62 = vsel %vm809_vm10, %v806_v54, %v808_v61  ;;  %913 = vmatpush.bf16.msrb.mxu3 %v888_v4  ;;  %900 = vmatpush.bf16.msrb.mxu2 %v885_v3  ;;  %v2242_v3 = vld [vmem:[%s3110_s1 + $0x30] sm:$0xf]  ;;  %vm1761_vm10 = vcmask 367616   ;;  %s2113_s23 = scalar_lea.hbm %s3112_s3, %s2306_s18 }
  0xfa   : > { %v823_v0 = vsel %vm215_vm0, %v812_v62, 0  ;;  %s2117_s28 = sshll.u32 %s2113_s23, 4  ;;  %s2118_s28 = int_to_ptr.hbm [resolvable:$true] %s2117_s28 }
  0xfb   : > { %858 = vmatpush.bf16.msrb.mxu1 %v823_v0 }
  0xfc   : > { %2231 = vmatmul.msk.bf16.vlgmr.msra.gmra.mxu3 %vm211_vm1, %v2230_v6 }
  0xfe   : > { %1621 = vrot.lane.b32.xlu1 %v2596_v12, %s2507_s19  ;;  %v876_v8 = vpop.permute.xlu0 %875 }
  0xff   : > { %1619 = vrot.lane.b32.xlu0 %v2605_v17, %s2507_s19  ;;  %v880_v9 = vsel %vm877_vm11, %v874_v59, %v876_v8  ;;  %vm1829_vm11 = vcmask 359424  }
 0x100   : > { %v940_v7 = vpop.permute.xlu1 %939  ;;  %1685 = vrot.lane.b32.xlu2 %v2598_v13, %s2508_s27  ;;  %v891_v15 = vsel %vm215_vm0, %v880_v9, 0 }
 0x101   : > { %v947_v10 = vsel %vm945_vm12, %v940_v7, %v942_v5 }
 0x102   : > { %v956_v18 = vsel %vm215_vm0, %v947_v10, 0  ;;  %v1078_v36 = vpop.permute.xlu2 %1077 }
 0x104   : > { %2227 = vmatmul.msk.bf16.vlgmr.msra.gmra.mxu0 %vm211_vm1, %v2226_v11  ;;  %2228 = vmatmul.msk.bf16.vlgmr.msra.gmra.mxu1 %vm211_vm1, %v2226_v11 }
 0x105   : > { %926 = vmatpush.bf16.msra.mxu0 %v891_v15 }
 0x106   : > { %2229 = vmatmul.msk.bf16.vlgmr.msra.gmra.mxu2 %vm211_vm1, %v2226_v11  ;;  %1623 = vrot.lane.b32.xlu1 %v2603_v16, %s2507_s19  ;;  %v938_v22 = vpop.permute.xlu0 %937 }
 0x107   : > { %981 = vmatpush.bf16.msra.mxu2 %v956_v18  ;;  %1687 = vrot.lane.b32.xlu0 %v2605_v17, %s2508_s27  ;;  %v946_v24 = vsel %vm945_vm12, %v938_v22, %v940_v7 }
 0x108   : > { %v944_v20 = vpop.permute.xlu1 %943  ;;  %1689 = vrot.lane.b32.xlu2 %v2596_v12, %s2508_s27  ;;  %v953_v25 = vsel %vm215_vm0, %v946_v24, 0 }
 0x109   : > { %v948_v21 = vsel %vm945_vm12, %v942_v5, %v944_v20  ;;  %968 = vmatpush.bf16.msra.mxu1 %v953_v25 }
 0x10a   : > { %v959_v23 = vsel %vm215_vm0, %v948_v21, 0  ;;  %v1080_v43 = vpop.permute.xlu2 %1079 }
 0x10b   : > { %994 = vmatpush.bf16.msra.mxu3 %v959_v23  ;;  %v1084_v46 = vsel %vm1081_vm14, %v1078_v36, %v1080_v43 }
 0x10c   : > { %2236 = vmatmul.msk.bf16.vlgmr.msrb.gmra.mxu3 %vm211_vm1, %v2234_v26  ;;  %v1095_v51 = vsel %vm215_vm0, %v1084_v46, 0 }
 0x10e   : > { %1755 = vrot.lane.b32.xlu1 %v2605_v17, %s2509_s7  ;;  %v1008_v30 = vpop.permute.xlu0 %1007 }
 0x10f   : > { %1691 = vrot.lane.b32.xlu0 %v2603_v16, %s2508_s27  ;;  %v1014_v31 = vsel %vm1013_vm13, %v1006_v19, %v1008_v30  ;;  %s2115_s27 = sshll.u32 %s2594_s5, 4  ;;  %s2116_s27 = int_to_ptr.vmem [resolvable:$true] %s2115_s27 }
 0x110   : > { %v1010_v29 = vpop.permute.xlu1 %1009  ;;  %1757 = vrot.lane.b32.xlu2 %v2596_v12, %s2509_s7  ;;  %v1021_v34 = vsel %vm215_vm0, %v1014_v31, 0 }
 0x111   : > { %v1015_v32 = vsel %vm1013_vm13, %v1008_v30, %v1010_v29  ;;  %v1016_v33 = vsel %vm1013_vm13, %v1010_v29, %v1012_v28 }
 0x112   : > { %v1024_v35 = vsel %vm215_vm0, %v1015_v32, 0  ;;  %v1027_v37 = vsel %vm215_vm0, %v1016_v33, 0  ;;  %v1212_v52 = vpop.permute.xlu2 %1211 }
 0x114   : > { %2232 = vmatmul.msk.bf16.vlgmr.msrb.gmra.mxu0 %vm211_vm1, %v2230_v6  ;;  %2233 = vmatmul.msk.bf16.vlgmr.msrb.gmra.mxu1 %vm211_vm1, %v2230_v6 }
 0x115   : > { %1036 = vmatpush.bf16.msrb.mxu0 %v1021_v34  ;;  %1049 = vmatpush.bf16.msrb.mxu1 %v1024_v35 }
 0x116   : > { %2235 = vmatmul.msk.bf16.vlgmr.msrb.gmra.mxu2 %vm211_vm1, %v2234_v26  ;;  %1759 = vrot.lane.b32.xlu1 %v2603_v16, %s2509_s7 }
 0x117   : > { %1062 = vmatpush.bf16.msrb.mxu2 %v1027_v37  ;;  %1753 = vrot.lane.b32.xlu0 %v2598_v13, %s2509_s7  ;;  %s2425_s7 = scalar_lea.hbm %s3112_s3, 24 }
 0x118   : > { %v1076_v38 = vpop.permute.xlu1 %1075  ;;  %1821 = vrot.lane.b32.xlu2 %v2598_v13, %s2510_s8 }
 0x119   : > { %v1074_v39 = vpop.permute.xlu0 %1073  ;;  %v1083_v45 = vsel %vm1081_vm14, %v1076_v38, %v1078_v36 }
 0x11a   : > { %v1082_v40 = vsel %vm1081_vm14, %v1074_v39, %v1076_v38  ;;  %v1216_v60 = vpop.permute.xlu2 %1215 }
 0x11b   : > { %v1089_v42 = vsel %vm215_vm0, %v1082_v40, 0 }
 0x11c   : > { %1104 = vmatpush.bf16.msrb.mxu3 %v1089_v42 }
 0x11d   : > { %2241 = vmatmul.msk.bf16.vlgmr.msra.gmra.mxu3 %vm211_vm1, %v2238_v41 }
 0x11e   : > { %1825 = vrot.lane.b32.xlu1 %v2596_v12, %s2510_s8  ;;  %v1092_v12 = vsel %vm215_vm0, %v1083_v45, 0 }
 0x11f   : > { %1823 = vrot.lane.b32.xlu0 %v2605_v17, %s2510_s8 }
 0x120   : > { %v1144_v44 = vpop.permute.xlu1 %1143  ;;  %1827 = vrot.lane.b32.xlu2 %v2603_v16, %s2510_s8 }
 0x121   : > { %v1142_v13 = vpop.permute.xlu0 %1141  ;;  %v234_v48 = vpop.f32.mrf.mxu0 }
 0x122   : > { %v1150_v47 = vsel %vm1149_vm15, %v1142_v13, %v1144_v44  ;;  %v247_v49 = vpop.f32.mrf.mxu1  ;;  %v294_v50 = vadd.f32 %v2824_v14, %v234_v48  ;;  %v1282_v15 = vpop.permute.xlu2 %1281 }
 0x123   : > { %v1157_v17 = vsel %vm215_vm0, %v1150_v47, 0 }
 0x124   : > { %2237 = vmatmul.msk.bf16.vlgmr.msra.gmra.mxu0 %vm211_vm1, %v2234_v26  ;;  %2239 = vmatmul.msk.bf16.vlgmr.msra.gmra.mxu1 %vm211_vm1, %v2238_v41 }
 0x125   : > { %1117 = vmatpush.bf16.msra.mxu0 %v1092_v12  ;;  %1130 = vmatpush.bf16.msra.mxu1 %v1095_v51  ;;  %v2254_v51 = vld [vmem:[%s3110_s1 + $0x3c] sm:$0xf] }
 0x126   : > { %2240 = vmatmul.msk.bf16.vlgmr.msra.gmra.mxu2 %vm211_vm1, %v2238_v41 }
 0x127   : > { %1172 = vmatpush.bf16.msra.mxu2 %v1157_v17 }
 0x128   : > { %v1148_v16 = vpop.permute.xlu1 %1147 }
 0x129   : > { %v260_v53 = vpop.f32.mrf.mxu2  ;;  %v1146_v54 = vpop.permute.xlu0 %1145 }
 0x12a   : > { %v1151_v55 = vsel %vm1149_vm15, %v1144_v44, %v1146_v54  ;;  %v236_v56 = vpop.f32.mrf.mxu0  ;;  %v249_v57 = vpop.f32.mrf.mxu1  ;;  %v1152_v0 = vsel %vm1149_vm15, %v1146_v54, %v1148_v16 }
 0x12b   : > { %v1160_v59 = vsel %vm215_vm0, %v1151_v55, 0  ;;  %v1163_v11 = vsel %vm215_vm0, %v1152_v0, 0  ;;  %v1348_v28 = vpop.permute.xlu2 %1347 }
 0x12c   : > { %1185 = vmatpush.bf16.msra.mxu3 %v1160_v59 }
 0x12d   : > { %2247 = vmatmul.msk.bf16.vlgmr.msrb.gmra.mxu3 %vm211_vm1, %v2883_v58 }
 0x12f   : > { %v371_v63 = vpop.f32.mrf.mxu3 }
 0x130   : > { %v1210_v61 = vpop.permute.xlu1 %1209 }
 0x131   : > { %v262_v62 = vpop.f32.mrf.mxu2  ;;  %v1218_v1 = vsel %vm1217_vm2, %v1210_v61, %v1212_v52  ;;  %v1214_v2 = vpop.permute.xlu0 %1213 }
 0x132   : > { %v1219_v4 = vsel %vm1217_vm2, %v1212_v52, %v1214_v2  ;;  %v1220_v5 = vsel %vm1217_vm2, %v1214_v2, %v1216_v60  ;;  %v306_v6 = vpop.f32.mrf.mxu0  ;;  %v319_v7 = vpop.f32.mrf.mxu1  ;;  %v1225_v14 = vsel %vm215_vm0, %v1218_v1, 0 }
 0x133   : > { %v1231_v8 = vsel %vm215_vm0, %v1220_v5, 0  ;;  %v307_v9 = vadd.f32 %v306_v6, %v247_v49  ;;  %v320_v10 = vadd.f32 %v319_v7, %v260_v53  ;;  %v1228_v18 = vsel %vm215_vm0, %v1219_v4, 0  ;;  %v1416_v52 = vpop.permute.xlu2 %1415 }
 0x134   : > { %1266 = vmatpush.bf16.msrb.mxu3 %v1231_v8  ;;  %2243 = vmatmul.msk.bf16.vlgmr.msrb.gmra.mxu0 %vm211_vm1, %v2242_v3 }
 0x135   : > { %v389_v19 = vadd.f32 %v371_v63, %v307_v9  ;;  %2244 = vmatmul.msk.bf16.vlgmr.msrb.gmra.mxu1 %vm211_vm1, %v2242_v3  ;;  %1198 = vmatpush.bf16.msrb.mxu0 %v1163_v11  ;;  %v2931_v11 = vld [vmem:[%s3110_s1 + $0x44] sm:$0xf] }
 0x136   : > { %2245 = vmatmul.msk.bf16.vlgmr.msrb.gmra.mxu2 %vm211_vm1, %v2242_v3  ;;  %1240 = vmatpush.bf16.msrb.mxu1 %v1225_v14 }
 0x137   : > { %1253 = vmatpush.bf16.msrb.mxu2 %v1228_v18  ;;  %v373_v23 = vpop.f32.mrf.mxu3 }
 0x138   : > { %v1280_v20 = vpop.permute.xlu1 %1279  ;;  %v2258_v23 = vld [vmem:[%s3110_s1 + $0x40] sm:$0xf] }
 0x139   : > { %v358_v21 = vpop.f32.mrf.mxu2  ;;  %v1278_v24 = vpop.permute.xlu0 %1277  ;;  %v1287_v33 = vsel %vm1285_vm4, %v1280_v20, %v1282_v15 }
 0x13a   : > { %v388_v22 = vadd.f32 %v358_v21, %v294_v50  ;;  %v308_v25 = vpop.f32.mrf.mxu0  ;;  %v321_v26 = vpop.f32.mrf.mxu1  ;;  %v1286_v34 = vsel %vm1285_vm4, %v1278_v24, %v1280_v20  ;;  %v1296_v42 = vsel %vm215_vm0, %v1287_v33, 0 }
 0x13b   : > { %v1293_v43 = vsel %vm215_vm0, %v1286_v34, 0  ;;  %v1420_v2 = vpop.permute.xlu2 %1419 }
 0x13d   : > { %2252 = vmatmul.msk.bf16.vlgmr.msra.gmra.mxu3 %vm211_vm1, %v2250_v27 }
 0x13f   : > { %v452_v32 = vpop.f32.mrf.mxu3 }
 0x140   : > { %v1346_v29 = vpop.permute.xlu1 %1345 }
 0x141   : > { %v360_v30 = vpop.f32.mrf.mxu2  ;;  %v1354_v31 = vsel %vm1353_vm3, %v1346_v29, %v1348_v28  ;;  %v1284_v36 = vpop.permute.xlu0 %1283 }
 0x142   : > { %v1361_v35 = vsel %vm215_vm0, %v1354_v31, 0  ;;  %v1288_v37 = vsel %vm1285_vm4, %v1282_v15, %v1284_v36  ;;  %v384_v38 = vpop.f32.mrf.mxu0  ;;  %v426_v39 = vpop.f32.mrf.mxu1 }
 0x143   : > { %1376 = vmatpush.bf16.msra.mxu3 %v1361_v35  ;;  %v390_v40 = vadd.f32 %v384_v38, %v320_v10  ;;  %v456_v41 = vadd.f32 %v426_v39, %v388_v22  ;;  %v1299_v44 = vsel %vm215_vm0, %v1288_v37, 0  ;;  %v1482_v15 = vpop.permute.xlu2 %1481 }
 0x144   : > { %2248 = vmatmul.msk.bf16.vlgmr.msra.gmra.mxu0 %vm211_vm1, %v2883_v58 }
 0x145   : > { %v458_v45 = vadd.f32 %v452_v32, %v390_v40  ;;  %2249 = vmatmul.msk.bf16.vlgmr.msra.gmra.mxu1 %vm211_vm1, %v2883_v58  ;;  %1308 = vmatpush.bf16.msra.mxu0 %v1293_v43  ;;  %v2266_v43 = vld [vmem:[%s3110_s1 + $0x48] sm:$0xf] }
 0x146   : > { %2251 = vmatmul.msk.bf16.vlgmr.msra.gmra.mxu2 %vm211_vm1, %v2250_v27  ;;  %1321 = vmatpush.bf16.msra.mxu1 %v1296_v42 }
 0x147   : > { %1334 = vmatpush.bf16.msra.mxu2 %v1299_v44  ;;  %v454_v48 = vpop.f32.mrf.mxu3 }
 0x148   : > { %v1414_v13 = vpop.permute.xlu1 %1413 }
 0x149   : > { %v439_v46 = vpop.f32.mrf.mxu2  ;;  %v1350_v49 = vpop.permute.xlu0 %1349  ;;  %v1422_v58 = vsel %vm1421_vm5, %v1414_v13, %v1416_v52 }
 0x14a   : > { %v457_v47 = vadd.f32 %v439_v46, %v389_v19  ;;  %v386_v50 = vpop.f32.mrf.mxu0  ;;  %v428_v12 = vpop.f32.mrf.mxu1  ;;  %v1355_v55 = vsel %vm1353_vm3, %v1348_v28, %v1350_v49  ;;  %v1429_v3 = vsel %vm215_vm0, %v1422_v58, 0 }
 0x14b   : > { %v1364_v0 = vsel %vm215_vm0, %v1355_v55, 0  ;;  %v1552_v34 = vpop.permute.xlu2 %1551 }
 0x14d   : > { %2257 = vmatmul.msk.bf16.vlgmr.msrb.gmra.mxu3 %vm211_vm1, %v2254_v51 }
 0x14f   : > { %v562_v54 = vpop.f32.mrf.mxu3 }
 0x150   : > { %v1418_v17 = vpop.permute.xlu1 %1417 }
 0x151   : > { %v441_v16 = vpop.f32.mrf.mxu2  ;;  %v1423_v53 = vsel %vm1421_vm5, %v1416_v52, %v1418_v17  ;;  %v1352_v57 = vpop.permute.xlu0 %1351  ;;  %v1424_v20 = vsel %vm1421_vm5, %v1418_v17, %v1420_v2 }
 0x152   : > { %v1432_v56 = vsel %vm215_vm0, %v1423_v53, 0  ;;  %v1356_v59 = vsel %vm1353_vm3, %v1350_v49, %v1352_v57  ;;  %v494_v60 = vpop.f32.mrf.mxu0  ;;  %v507_v61 = vpop.f32.mrf.mxu1  ;;  %v1435_v31 = vsel %vm215_vm0, %v1424_v20, 0 }
 0x153   : > { %1457 = vmatpush.bf16.msrb.mxu3 %v1432_v56  ;;  %v524_v62 = vadd.f32 %v494_v60, %v456_v41  ;;  %v525_v63 = vadd.f32 %v507_v61, %v457_v47  ;;  %v1367_v1 = vsel %vm215_vm0, %v1356_v59, 0 }
 0x154   : > { %2253 = vmatmul.msk.bf16.vlgmr.msrb.gmra.mxu0 %vm211_vm1, %v2250_v27 }
 0x155   : > { %v592_v4 = vadd.f32 %v562_v54, %v524_v62  ;;  %2255 = vmatmul.msk.bf16.vlgmr.msrb.gmra.mxu1 %vm211_vm1, %v2254_v51  ;;  %1389 = vmatpush.bf16.msrb.mxu0 %v1364_v0 }
 0x156   : > { %2256 = vmatmul.msk.bf16.vlgmr.msrb.gmra.mxu2 %vm211_vm1, %v2254_v51  ;;  %1402 = vmatpush.bf16.msrb.mxu1 %v1367_v1  ;;  %v2270_v1 = vld [vmem:[%s3110_s1 + $0x4c] sm:$0xf] }
 0x157   : > { %1444 = vmatpush.bf16.msrb.mxu2 %v1429_v3  ;;  %v564_v7 = vpop.f32.mrf.mxu3 }
 0x158   : > { %v1486_v14 = vpop.permute.xlu1 %1485 }
 0x159   : > { %v520_v5 = vpop.f32.mrf.mxu2  ;;  %v1484_v8 = vpop.permute.xlu0 %1483 }
 0x15a   : > { %v526_v6 = vadd.f32 %v520_v5, %v458_v45  ;;  %v496_v9 = vpop.f32.mrf.mxu0  ;;  %v509_v10 = vpop.f32.mrf.mxu1  ;;  %v1490_v21 = vsel %vm1489_vm6, %v1482_v15, %v1484_v8  ;;  %v1491_v24 = vsel %vm1489_vm6, %v1484_v8, %v1486_v14 }
 0x15b   : > { %v1497_v32 = vsel %vm215_vm0, %v1490_v21, 0  ;;  %v1500_v35 = vsel %vm215_vm0, %v1491_v24, 0  ;;  %v1618_v45 = vpop.permute.xlu2 %1617 }
 0x15d   : > { %2263 = vmatmul.msk.bf16.vlgmr.msra.gmra.mxu3 %vm211_vm1, %v2931_v11 }
 0x15f   : > { %v643_v19 = vpop.f32.mrf.mxu3 }
 0x160   : > { %v1550_v33 = vpop.permute.xlu1 %1549 }
 0x161   : > { %v522_v18 = vpop.f32.mrf.mxu2  ;;  %v1488_v22 = vpop.permute.xlu0 %1487  ;;  %v1558_v47 = vsel %vm1557_vm7, %v1550_v33, %v1552_v34 }
 0x162   : > { %v1492_v25 = vsel %vm1489_vm6, %v1486_v14, %v1488_v22  ;;  %v575_v26 = vpop.f32.mrf.mxu0  ;;  %v588_v27 = vpop.f32.mrf.mxu1  ;;  %v1565_v54 = vsel %vm215_vm0, %v1558_v47, 0 }
 0x163   : > { %v1503_v28 = vsel %vm215_vm0, %v1492_v25, 0  ;;  %v593_v29 = vadd.f32 %v575_v26, %v525_v63  ;;  %v594_v30 = vadd.f32 %v588_v27, %v526_v6  ;;  %v1686_v57 = vpop.permute.xlu2 %1685 }
 0x164   : > { %1538 = vmatpush.bf16.msra.mxu3 %v1503_v28  ;;  %2259 = vmatmul.msk.bf16.vlgmr.msra.gmra.mxu0 %vm211_vm1, %v2258_v23 }
 0x165   : > { %v661_v36 = vadd.f32 %v643_v19, %v593_v29  ;;  %2260 = vmatmul.msk.bf16.vlgmr.msra.gmra.mxu1 %vm211_vm1, %v2258_v23  ;;  %1470 = vmatpush.bf16.msra.mxu0 %v1435_v31  ;;  %v2278_v31 = vld [vmem:[%s3110_s1 + $0x54] sm:$0xf] }
 0x166   : > { %2261 = vmatmul.msk.bf16.vlgmr.msra.gmra.mxu2 %vm211_vm1, %v2258_v23  ;;  %1512 = vmatpush.bf16.msra.mxu1 %v1497_v32 }
 0x167   : > { %1525 = vmatpush.bf16.msra.mxu2 %v1500_v35  ;;  %v645_v39 = vpop.f32.mrf.mxu3 }
 0x168   : > { %v1556_v44 = vpop.permute.xlu1 %1555 }
 0x169   : > { %v630_v37 = vpop.f32.mrf.mxu2  ;;  %v1554_v40 = vpop.permute.xlu0 %1553 }
 0x16a   : > { %v660_v38 = vadd.f32 %v630_v37, %v592_v4  ;;  %v577_v41 = vpop.f32.mrf.mxu0  ;;  %v590_v42 = vpop.f32.mrf.mxu1  ;;  %v1559_v48 = vsel %vm1557_vm7, %v1552_v34, %v1554_v40  ;;  %v1560_v50 = vsel %vm1557_vm7, %v1554_v40, %v1556_v44 }
 0x16b   : > { %v1568_v55 = vsel %vm215_vm0, %v1559_v48, 0  ;;  %v1571_v58 = vsel %vm215_vm0, %v1560_v50, 0  ;;  %v1690_v3 = vpop.permute.xlu2 %1689  ;;  %v2274_v41 = vld [vmem:[%s3110_s1 + $0x50] sm:$0xf] }
 0x16d   : > { %2268 = vmatmul.msk.bf16.vlgmr.msrb.gmra.mxu3 %vm211_vm1, %v2266_v43 }
 0x16f   : > { %v724_v46 = vpop.f32.mrf.mxu3 }
 0x170   : > { %v1622_v56 = vpop.permute.xlu1 %1621 }
 0x171   : > { %v632_v13 = vpop.f32.mrf.mxu2  ;;  %v1620_v49 = vpop.permute.xlu0 %1619 }
 0x172   : > { %v1626_v12 = vsel %vm1625_vm8, %v1618_v45, %v1620_v49  ;;  %v656_v51 = vpop.f32.mrf.mxu0  ;;  %v698_v52 = vpop.f32.mrf.mxu1  ;;  %v1627_v9 = vsel %vm1625_vm8, %v1620_v49, %v1622_v56 }
 0x173   : > { %v1633_v17 = vsel %vm215_vm0, %v1626_v12, 0  ;;  %v662_v16 = vadd.f32 %v656_v51, %v594_v30  ;;  %v728_v53 = vadd.f32 %v698_v52, %v660_v38  ;;  %v1636_v20 = vsel %vm215_vm0, %v1627_v9, 0  ;;  %v1758_v33 = vpop.permute.xlu2 %1757 }
 0x174   : > { %1648 = vmatpush.bf16.msrb.mxu3 %v1633_v17  ;;  %2264 = vmatmul.msk.bf16.vlgmr.msrb.gmra.mxu0 %vm211_vm1, %v2931_v11 }
 0x175   : > { %v730_v59 = vadd.f32 %v724_v46, %v662_v16  ;;  %2265 = vmatmul.msk.bf16.vlgmr.msrb.gmra.mxu1 %vm211_vm1, %v2931_v11  ;;  %1580 = vmatpush.bf16.msrb.mxu0 %v1565_v54 }
 0x176   : > { %2267 = vmatmul.msk.bf16.vlgmr.msrb.gmra.mxu2 %vm211_vm1, %v2266_v43  ;;  %1593 = vmatpush.bf16.msrb.mxu1 %v1568_v55 }
 0x177   : > { %1606 = vmatpush.bf16.msrb.mxu2 %v1571_v58  ;;  %v726_v62 = vpop.f32.mrf.mxu3 }
 0x178   : > { %v1624_v2 = vpop.permute.xlu1 %1623 }
 0x179   : > { %v711_v60 = vpop.f32.mrf.mxu2  ;;  %v1688_v4 = vpop.permute.xlu0 %1687  ;;  %v1628_v10 = vsel %vm1625_vm8, %v1622_v56, %v1624_v2 }
 0x17a   : > { %v729_v61 = vadd.f32 %v711_v60, %v661_v36  ;;  %v658_v63 = vpop.f32.mrf.mxu0  ;;  %v700_v0 = vpop.f32.mrf.mxu1  ;;  %v1695_v5 = vsel %vm1693_vm9, %v1688_v4, %v1690_v3  ;;  %v1694_v11 = vsel %vm1693_vm9, %v1686_v57, %v1688_v4  ;;  %v1639_v21 = vsel %vm215_vm0, %v1628_v10, 0 }
 0x17b   : > { %v1704_v6 = vsel %vm215_vm0, %v1695_v5, 0  ;;  %v1701_v23 = vsel %vm215_vm0, %v1694_v11, 0  ;;  %v1822_v50 = vpop.permute.xlu2 %1821  ;;  %v2286_v11 = vld [vmem:[%s3110_s1 + $0x5c] sm:$0xf] }
 0x17d   : > { %2273 = vmatmul.msk.bf16.vlgmr.msra.gmra.mxu3 %vm211_vm1, %v2270_v1 }
 0x17e   : > { %1729 = vmatpush.bf16.msra.mxu3 %v1704_v6 }
 0x17f   : > { %v834_v8 = vpop.f32.mrf.mxu3 }
 0x180   : > { %v1756_v22 = vpop.permute.xlu1 %1755 }
 0x181   : > { %v713_v7 = vpop.f32.mrf.mxu2  ;;  %v1692_v25 = vpop.permute.xlu0 %1691  ;;  %v1763_v42 = vsel %vm1761_vm10, %v1756_v22, %v1758_v33 }
 0x182   : > { %v766_v14 = vpop.f32.mrf.mxu0  ;;  %v779_v15 = vpop.f32.mrf.mxu1  ;;  %v1696_v39 = vsel %vm1693_vm9, %v1690_v3, %v1692_v25  ;;  %v1772_v48 = vsel %vm215_vm0, %v1763_v42, 0 }
 0x183   : > { %v796_v18 = vadd.f32 %v766_v14, %v728_v53  ;;  %v797_v19 = vadd.f32 %v779_v15, %v729_v61  ;;  %v1707_v46 = vsel %vm215_vm0, %v1696_v39, 0  ;;  %v2282_v53 = vld [vmem:[%s3110_s1 + $0x58] sm:$0xf]  ;;  %v1828_v56 = vpop.permute.xlu2 %1827 }
 0x184   : > { %2269 = vmatmul.msk.bf16.vlgmr.msra.gmra.mxu0 %vm211_vm1, %v2266_v43 }
 0x185   : > { %v864_v24 = vadd.f32 %v834_v8, %v796_v18  ;;  %2271 = vmatmul.msk.bf16.vlgmr.msra.gmra.mxu1 %vm211_vm1, %v2270_v1  ;;  %1661 = vmatpush.bf16.msra.mxu0 %v1636_v20 }
 0x186   : > { %2272 = vmatmul.msk.bf16.vlgmr.msra.gmra.mxu2 %vm211_vm1, %v2270_v1  ;;  %1674 = vmatpush.bf16.msra.mxu1 %v1639_v21 }
 0x187   : > { %1716 = vmatpush.bf16.msra.mxu2 %v1701_v23  ;;  %v836_v28 = vpop.f32.mrf.mxu3 }
 0x188   : > { %v1760_v32 = vpop.permute.xlu1 %1759 }
 0x189   : > { %v792_v26 = vpop.f32.mrf.mxu2  ;;  %v1764_v34 = vsel %vm1761_vm10, %v1758_v33, %v1760_v32  ;;  %v1754_v36 = vpop.permute.xlu0 %1753 }
 0x18a   : > { %v798_v27 = vadd.f32 %v792_v26, %v730_v59  ;;  %v768_v29 = vpop.f32.mrf.mxu0  ;;  %v781_v30 = vpop.f32.mrf.mxu1  ;;  %v1775_v35 = vsel %vm215_vm0, %v1764_v34, 0  ;;  %v1762_v40 = vsel %vm1761_vm10, %v1754_v36, %v1756_v22 }
 0x18b   : > { %v1769_v47 = vsel %vm215_vm0, %v1762_v40, 0  ;;  %v2290_v30 = vld [vmem:[%s3110_s1 + $0x60] sm:$0xf] }
 0x18d   : > { %2279 = vmatmul.msk.bf16.vlgmr.msrb.gmra.mxu3 %vm211_vm1, %v2278_v31 }
 0x18e   : > { %1810 = vmatpush.bf16.msrb.mxu3 %v1775_v35 }
 0x18f   : > { %v915_v38 = vpop.f32.mrf.mxu3 }
 0x190   : > { %v1826_v54 = vpop.permute.xlu1 %1825 }
 0x191   : > { %v794_v37 = vpop.f32.mrf.mxu2  ;;  %v1824_v55 = vpop.permute.xlu0 %1823  ;;  %v1832_v61 = vsel %vm1829_vm11, %v1826_v54, %v1828_v56 }
 0x192   : > { %v847_v43 = vpop.f32.mrf.mxu0  ;;  %v860_v44 = vpop.f32.mrf.mxu1  ;;  %v1830_v59 = vsel %vm1829_vm11, %v1822_v50, %v1824_v55  ;;  %v1831_v60 = vsel %vm1829_vm11, %v1824_v55, %v1826_v54  ;;  %v1843_v4 = vsel %vm215_vm0, %v1832_v61, 0 }
 0x193   : > { %v865_v45 = vadd.f32 %v847_v43, %v797_v19  ;;  %v866_v13 = vadd.f32 %v860_v44, %v798_v27  ;;  %v1837_v2 = vsel %vm215_vm0, %v1830_v59, 0  ;;  %v1840_v3 = vsel %vm215_vm0, %v1831_v60, 0 }
 0x194   : > { %2275 = vmatmul.msk.bf16.vlgmr.msrb.gmra.mxu0 %vm211_vm1, %v2274_v41 }
 0x195   : > { %v933_v49 = vadd.f32 %v915_v38, %v865_v45  ;;  %2276 = vmatmul.msk.bf16.vlgmr.msrb.gmra.mxu1 %vm211_vm1, %v2274_v41  ;;  %1742 = vmatpush.bf16.msrb.mxu0 %v1707_v46 }
 0x196   : > { %2277 = vmatmul.msk.bf16.vlgmr.msrb.gmra.mxu2 %vm211_vm1, %v2274_v41  ;;  %1784 = vmatpush.bf16.msrb.mxu1 %v1769_v47 }
 0x197   : > { %1797 = vmatpush.bf16.msrb.mxu2 %v1772_v48  ;;  %v917_v52 = vpop.f32.mrf.mxu3 }
 0x199   : > { %v902_v12 = vpop.f32.mrf.mxu2 }
 0x19a   : > { %v932_v51 = vadd.f32 %v902_v12, %v864_v24  ;;  %v849_v17 = vpop.f32.mrf.mxu0  ;;  %v862_v16 = vpop.f32.mrf.mxu1 }
 0x19d   : > { %2284 = vmatmul.msk.bf16.vlgmr.msra.gmra.mxu3 %vm211_vm1, %v2282_v53 }
 0x1a0   : > { %v996_v58 = vpop.f32.mrf.mxu3 }
 0x1a1   : > { %v904_v57 = vpop.f32.mrf.mxu2 }
 0x1a2   : > { %v928_v62 = vpop.f32.mrf.mxu0  ;;  %v970_v63 = vpop.f32.mrf.mxu1 }
 0x1a3   : > { %v934_v0 = vadd.f32 %v928_v62, %v866_v13  ;;  %v1000_v1 = vadd.f32 %v970_v63, %v932_v51 }
 0x1a4   : > { %2280 = vmatmul.msk.bf16.vlgmr.msra.gmra.mxu0 %vm211_vm1, %v2278_v31 }
 0x1a5   : > { %v1002_v5 = vadd.f32 %v996_v58, %v934_v0  ;;  %2281 = vmatmul.msk.bf16.vlgmr.msra.gmra.mxu1 %vm211_vm1, %v2278_v31  ;;  %1852 = vmatpush.bf16.msra.mxu0 %v1837_v2 }
 0x1a6   : > { %2283 = vmatmul.msk.bf16.vlgmr.msra.gmra.mxu2 %vm211_vm1, %v2282_v53  ;;  %1865 = vmatpush.bf16.msra.mxu1 %v1840_v3 }
 0x1a7   : > { %1878 = vmatpush.bf16.msra.mxu2 %v1843_v4 }
 0x1a8   : > { %v998_v8 = vpop.f32.mrf.mxu3 }
 0x1a9   : > { %v983_v6 = vpop.f32.mrf.mxu2 }
 0x1aa   : > { %v1001_v7 = vadd.f32 %v983_v6, %v933_v49  ;;  %v930_v9 = vpop.f32.mrf.mxu0  ;;  %v972_v10 = vpop.f32.mrf.mxu1 }
 0x1ad   : > { %2289 = vmatmul.msk.bf16.vlgmr.msrb.gmra.mxu3 %vm211_vm1, %v2286_v11 }
 0x1b0   : > { %v1106_v15 = vpop.f32.mrf.mxu3 }
 0x1b1   : > { %v985_v14 = vpop.f32.mrf.mxu2 }
 0x1b2   : > { %v1038_v18 = vpop.f32.mrf.mxu0  ;;  %v1051_v19 = vpop.f32.mrf.mxu1 }
 0x1b3   : > { %v1068_v20 = vadd.f32 %v1038_v18, %v1000_v1  ;;  %v1069_v21 = vadd.f32 %v1051_v19, %v1001_v7 }
 0x1b4   : > { %2285 = vmatmul.msk.bf16.vlgmr.msrb.gmra.mxu0 %vm211_vm1, %v2282_v53 }
 0x1b5   : > { %v1136_v22 = vadd.f32 %v1106_v15, %v1068_v20  ;;  %2287 = vmatmul.msk.bf16.vlgmr.msrb.gmra.mxu1 %vm211_vm1, %v2286_v11 }
 0x1b6   : > { %2288 = vmatmul.msk.bf16.vlgmr.msrb.gmra.mxu2 %vm211_vm1, %v2286_v11 }
 0x1b8   : > { %v1108_v25 = vpop.f32.mrf.mxu3 }
 0x1b9   : > { %v1064_v23 = vpop.f32.mrf.mxu2 }
 0x1ba   : > { %v1070_v24 = vadd.f32 %v1064_v23, %v1002_v5  ;;  %v1040_v26 = vpop.f32.mrf.mxu0  ;;  %v1053_v27 = vpop.f32.mrf.mxu1 }
 0x1c0   : > { %v1187_v29 = vpop.f32.mrf.mxu3 }
 0x1c1   : > { %v1066_v28 = vpop.f32.mrf.mxu2 }
 0x1c2   : > { %v1119_v31 = vpop.f32.mrf.mxu0  ;;  %v1132_v32 = vpop.f32.mrf.mxu1 }
 0x1c3   : > { %v1137_v33 = vadd.f32 %v1119_v31, %v1069_v21  ;;  %v1138_v34 = vadd.f32 %v1132_v32, %v1070_v24 }
 0x1c4   : > { %2291 = vmatmul.msk.bf16.vlgmr.msra.gmra.mxu0 %vm211_vm1, %v2290_v30 }
 0x1c5   : > { %v1205_v35 = vadd.f32 %v1187_v29, %v1137_v33  ;;  %2292 = vmatmul.msk.bf16.vlgmr.msra.gmra.mxu1 %vm211_vm1, %v2290_v30 }
 0x1c6   : > { %2293 = vmatmul.msk.bf16.vlgmr.msra.gmra.mxu2 %vm211_vm1, %v2290_v30 }
 0x1c8   : > { %v1189_v38 = vpop.f32.mrf.mxu3 }
 0x1c9   : > { %v1174_v36 = vpop.f32.mrf.mxu2 }
 0x1ca   : > { %v1204_v37 = vadd.f32 %v1174_v36, %v1136_v22  ;;  %v1121_v39 = vpop.f32.mrf.mxu0  ;;  %v1134_v40 = vpop.f32.mrf.mxu1 }
 0x1d0   : > { %v1268_v42 = vpop.f32.mrf.mxu3 }
 0x1d1   : > { %v1176_v41 = vpop.f32.mrf.mxu2 }
 0x1d2   : > { %v1200_v43 = vpop.f32.mrf.mxu0  ;;  %v1242_v44 = vpop.f32.mrf.mxu1 }
 0x1d3   : > { %v1206_v45 = vadd.f32 %v1200_v43, %v1138_v34  ;;  %v1272_v13 = vadd.f32 %v1242_v44, %v1204_v37 }
 0x1d5   : > { %v1274_v46 = vadd.f32 %v1268_v42, %v1206_v45 }
 0x1d8   : > { %v1270_v49 = vpop.f32.mrf.mxu3 }
 0x1d9   : > { %v1255_v47 = vpop.f32.mrf.mxu2 }
 0x1da   : > { %v1273_v48 = vadd.f32 %v1255_v47, %v1205_v35  ;;  %v1202_v50 = vpop.f32.mrf.mxu0  ;;  %v1244_v12 = vpop.f32.mrf.mxu1 }
 0x1e0   : > { %v1378_v52 = vpop.f32.mrf.mxu3 }
 0x1e1   : > { %v1257_v51 = vpop.f32.mrf.mxu2 }
 0x1e2   : > { %v1310_v17 = vpop.f32.mrf.mxu0  ;;  %v1323_v16 = vpop.f32.mrf.mxu1 }
 0x1e3   : > { %v1340_v53 = vadd.f32 %v1310_v17, %v1272_v13  ;;  %v1341_v54 = vadd.f32 %v1323_v16, %v1273_v48 }
 0x1e5   : > { %v1408_v55 = vadd.f32 %v1378_v52, %v1340_v53 }
 0x1e8   : > { %v1380_v58 = vpop.f32.mrf.mxu3 }
 0x1e9   : > { %v1336_v56 = vpop.f32.mrf.mxu2 }
 0x1ea   : > { %v1342_v57 = vadd.f32 %v1336_v56, %v1274_v46  ;;  %v1312_v59 = vpop.f32.mrf.mxu0  ;;  %v1325_v60 = vpop.f32.mrf.mxu1 }
 0x1f0   : > { %v1459_v62 = vpop.f32.mrf.mxu3 }
 0x1f1   : > { %v1338_v61 = vpop.f32.mrf.mxu2 }
 0x1f2   : > { %v1391_v63 = vpop.f32.mrf.mxu0  ;;  %v1404_v0 = vpop.f32.mrf.mxu1 }
 0x1f3   : > { %v1409_v1 = vadd.f32 %v1391_v63, %v1341_v54  ;;  %v1410_v2 = vadd.f32 %v1404_v0, %v1342_v57 }
 0x1f5   : > { %v1477_v3 = vadd.f32 %v1459_v62, %v1409_v1 }
 0x1f8   : > { %v1461_v5 = vpop.f32.mrf.mxu3 }
 0x1f9   : > { %v1446_v4 = vpop.f32.mrf.mxu2 }
 0x1fa   : > { %v1393_v6 = vpop.f32.mrf.mxu0  ;;  %v1406_v7 = vpop.f32.mrf.mxu1  ;;  %v1476_v40 = vadd.f32 %v1446_v4, %v1408_v55 }
 0x200   : > { %v1540_v9 = vpop.f32.mrf.mxu3 }
 0x201   : > { %v1448_v8 = vpop.f32.mrf.mxu2 }
 0x202   : > { %v1472_v10 = vpop.f32.mrf.mxu0  ;;  %v1514_v11 = vpop.f32.mrf.mxu1 }
 0x203   : > { %v1544_v41 = vadd.f32 %v1514_v11, %v1476_v40  ;;  %v1478_v44 = vadd.f32 %v1472_v10, %v1410_v2 }
 0x205   : > { %v1546_v50 = vadd.f32 %v1540_v9, %v1478_v44 }
 0x208   : > { %v1542_v15 = vpop.f32.mrf.mxu3 }
 0x209   : > { %v1527_v14 = vpop.f32.mrf.mxu2 }
 0x20a   : > { %v1474_v18 = vpop.f32.mrf.mxu0  ;;  %v1516_v19 = vpop.f32.mrf.mxu1  ;;  %v1545_v42 = vadd.f32 %v1527_v14, %v1477_v3 }
 0x210   : > { %v1650_v21 = vpop.f32.mrf.mxu3 }
 0x211   : > { %v1529_v20 = vpop.f32.mrf.mxu2 }
 0x212   : > { %v1582_v22 = vpop.f32.mrf.mxu0  ;;  %v1595_v23 = vpop.f32.mrf.mxu1 }
 0x213   : > { %v1612_v13 = vadd.f32 %v1582_v22, %v1544_v41  ;;  %v1613_v46 = vadd.f32 %v1595_v23, %v1545_v42 }
 0x215   : > { %v1680_v12 = vadd.f32 %v1650_v21, %v1612_v13 }
 0x218   : > { %v1652_v25 = vpop.f32.mrf.mxu3 }
 0x219   : > { %v1608_v24 = vpop.f32.mrf.mxu2 }
 0x21a   : > { %v1584_v26 = vpop.f32.mrf.mxu0  ;;  %v1597_v27 = vpop.f32.mrf.mxu1  ;;  %v1614_v51 = vadd.f32 %v1608_v24, %v1546_v50 }
 0x220   : > { %v1731_v29 = vpop.f32.mrf.mxu3 }
 0x221   : > { %v1610_v28 = vpop.f32.mrf.mxu2 }
 0x222   : > { %v1663_v30 = vpop.f32.mrf.mxu0  ;;  %v1676_v31 = vpop.f32.mrf.mxu1 }
 0x223   : > { %v1681_v49 = vadd.f32 %v1663_v30, %v1613_v46  ;;  %v1682_v53 = vadd.f32 %v1676_v31, %v1614_v51 }
 0x225   : > { %v1749_v52 = vadd.f32 %v1731_v29, %v1681_v49 }
 0x228   : > { %v1733_v33 = vpop.f32.mrf.mxu3 }
 0x229   : > { %v1718_v32 = vpop.f32.mrf.mxu2 }
 0x22a   : > { %v1665_v34 = vpop.f32.mrf.mxu0  ;;  %v1678_v35 = vpop.f32.mrf.mxu1  ;;  %v1748_v17 = vadd.f32 %v1718_v32, %v1680_v12 }
 0x230   : > { %v1812_v37 = vpop.f32.mrf.mxu3 }
 0x231   : > { %v1720_v36 = vpop.f32.mrf.mxu2 }
 0x232   : > { %v1744_v38 = vpop.f32.mrf.mxu0  ;;  %v1786_v39 = vpop.f32.mrf.mxu1 }
 0x233   : > { %v1816_v54 = vadd.f32 %v1786_v39, %v1748_v17  ;;  %v1750_v55 = vadd.f32 %v1744_v38, %v1682_v53 }
 0x235   : > { %v1818_v63 = vadd.f32 %v1812_v37, %v1750_v55 }
 0x238   : > { %v1814_v45 = vpop.f32.mrf.mxu3 }
 0x239   : > { %v1799_v43 = vpop.f32.mrf.mxu2 }
 0x23a   : > { %v1746_v47 = vpop.f32.mrf.mxu0  ;;  %v1788_v48 = vpop.f32.mrf.mxu1  ;;  %v1817_v56 = vadd.f32 %v1799_v43, %v1749_v52 }
 0x241   : > { %v1801_v16 = vpop.f32.mrf.mxu2 }
 0x242   : > { %v1854_v57 = vpop.f32.mrf.mxu0  ;;  %v1867_v58 = vpop.f32.mrf.mxu1 }
 0x243   : > { %v3013_v59 = vadd.f32 %v1854_v57, %v1816_v54  ;;  %v3015_v60 = vadd.f32 %v1867_v58, %v1817_v56 }
 0x245   : > { %v1890_v61 = vmul.f32 0.70710677, %v3013_v59  ;;  %v1891_v62 = vmul.f32 0.70710677, %v3015_v60 }
 0x247   : > { %v3019_v0 = vclamps-f32 %v1890_v61, 4.0  ;;  %v3021_v1 = vclamps-f32 %v1891_v62, 4.0 }
 0x249   : > { %v1880_v2 = vpop.f32.mrf.mxu2  ;;  %v1899_v4 = vmul.f32 %v3019_v0, %v3019_v0  ;;  %v3029_v5 = vmul.f32 %v3021_v1, %v3021_v1 }
 0x24a   : > { %v3023_v3 = vadd.f32 %v1880_v2, %v1818_v63  ;;  %v1856_v7 = vpop.f32.mrf.mxu0  ;;  %v1869_v8 = vpop.f32.mrf.mxu1 }
 0x24b   : > { %v1902_v9 = vmul.f32 -2.7261424e-10, %v1899_v4  ;;  %v1941_v10 = vmul.f32 -1.45660715e-05, %v1899_v4  ;;  %v1903_v11 = vmul.f32 -2.7261424e-10, %v3029_v5 }
 0x24c   : > { %v1892_v6 = vmul.f32 0.70710677, %v3023_v3  ;;  %v1942_v14 = vmul.f32 -1.45660715e-05, %v3029_v5 }
 0x24d   : > { %v1905_v18 = vadd.f32 2.7706815e-08, %v1902_v9  ;;  %v1944_v19 = vadd.f32 -0.00021337405, %v1941_v10  ;;  %v1906_v20 = vadd.f32 2.7706815e-08, %v1903_v11 }
 0x24e   : > { %v3034_v15 = vclamps-f32 %v1892_v6, 4.0  ;;  %v1945_v21 = vadd.f32 -0.00021337405, %v1942_v14 }
 0x24f   : > { %v1908_v23 = vmul.f32 %v1905_v18, %v1899_v4  ;;  %v1947_v24 = vmul.f32 %v1944_v19, %v1899_v4  ;;  %v1909_v25 = vmul.f32 %v1906_v20, %v3029_v5 }
 0x250   : > { %v1901_v22 = vmul.f32 %v3034_v15, %v3034_v15  ;;  %v1948_v27 = vmul.f32 %v1945_v21, %v3029_v5 }
 0x251   : > { %v1882_v26 = vpop.f32.mrf.mxu2  ;;  %v1911_v30 = vadd.f32 -2.101024e-06, %v1908_v23  ;;  %v1950_v31 = vadd.f32 -0.001682827, %v1947_v24  ;;  %v1912_v32 = vadd.f32 -2.101024e-06, %v1909_v25 }
 0x252   : > { %v1904_v28 = vmul.f32 -2.7261424e-10, %v1901_v22  ;;  %v1943_v29 = vmul.f32 -1.45660715e-05, %v1901_v22  ;;  %v1951_v33 = vadd.f32 -0.001682827, %v1948_v27 }
 0x253   : > { %v1914_v36 = vmul.f32 %v1911_v30, %v1899_v4  ;;  %v1953_v37 = vmul.f32 %v1950_v31, %v1899_v4  ;;  %v1915_v38 = vmul.f32 %v1912_v32, %v3029_v5  ;;  %v1887_v31 = vmul.f32 0.5, %v3013_v59  ;;  %v1983_v59 = vld [vmem:[%s3111_s2] sm:$0x3] }
 0x254   : > { %v1907_v34 = vadd.f32 2.7706815e-08, %v1904_v28  ;;  %v1946_v35 = vadd.f32 -0.00021337405, %v1943_v29  ;;  %v1954_v39 = vmul.f32 %v1951_v33, %v3029_v5  ;;  %v1888_v33 = vmul.f32 0.5, %v3015_v60 }
 0x255   : > { %v1917_v42 = vadd.f32 -5.6925062e-05, %v1914_v36  ;;  %v1956_v43 = vadd.f32 -0.0073733293, %v1953_v37  ;;  %v1918_v44 = vadd.f32 -5.6925062e-05, %v1915_v38 }
 0x256   : > { %v1910_v40 = vmul.f32 %v1907_v34, %v1901_v22  ;;  %v1949_v41 = vmul.f32 %v1946_v35, %v1901_v22  ;;  %v1957_v45 = vadd.f32 -0.0073733293, %v1954_v39  ;;  %v1889_v39 = vmul.f32 0.5, %v3023_v3 }
 0x257   : > { %v1920_v47 = vmul.f32 %v1917_v42, %v1899_v4  ;;  %v1959_v48 = vmul.f32 %v1956_v43, %v1899_v4  ;;  %v1921_v49 = vmul.f32 %v1918_v44, %v3029_v5 }
 0x258   : > { %v1913_v13 = vadd.f32 -2.101024e-06, %v1910_v40  ;;  %v1952_v46 = vadd.f32 -0.001682827, %v1949_v41  ;;  %v1960_v50 = vmul.f32 %v1957_v45, %v3029_v5 }
 0x259   : > { %v1923_v52 = vadd.f32 -0.00073499064, %v1920_v47  ;;  %v1962_v17 = vadd.f32 -0.014264739, %v1959_v48  ;;  %v1924_v16 = vadd.f32 -0.00073499064, %v1921_v49 }
 0x25a   : > { %v1916_v12 = vmul.f32 %v1913_v13, %v1901_v22  ;;  %v1955_v51 = vmul.f32 %v1952_v46, %v1901_v22  ;;  %v1963_v53 = vadd.f32 -0.014264739, %v1960_v50 }
 0x25b   : > { %v1926_v55 = vmul.f32 %v1923_v52, %v1899_v4  ;;  %v1968_v57 = vsub.f32 0.0, %v1962_v17  ;;  %v1927_v58 = vmul.f32 %v1924_v16, %v3029_v5 }
 0x25c   : > { %v1919_v54 = vadd.f32 -5.6925062e-05, %v1916_v12  ;;  %v1958_v56 = vadd.f32 -0.0073733293, %v1955_v51  ;;  %v1969_v61 = vsub.f32 0.0, %v1963_v53 }
 0x25d   : > { %v1929_v2 = vadd.f32 -0.0029546, %v1926_v55  ;;  %v1930_v6 = vadd.f32 -0.0029546, %v1927_v58  ;;  %2387 = vrcp.f32 %v1968_v57 }
 0x25e   : > { %v1922_v62 = vmul.f32 %v1919_v54, %v1901_v22  ;;  %v1961_v63 = vmul.f32 %v1958_v56, %v1901_v22  ;;  %2389 = vrcp.f32 %v1969_v61 }
 0x25f   : > { %v1932_v9 = vmul.f32 %v1929_v2, %v1899_v4  ;;  %v1933_v10 = vmul.f32 %v1930_v6, %v3029_v5  ;;  %v2055_v6 = vld [vmem:[#allocation2 + $0x18] sm:$0xf] }
 0x260   : > { %v1925_v7 = vadd.f32 -0.00073499064, %v1922_v62  ;;  %v1964_v8 = vadd.f32 -0.014264739, %v1961_v63  ;;  %v2056_v62 = vld [vmem:[#allocation2 + $0x8] sm:$0xf] }
 0x261   : > { %v1935_v14 = vadd.f32 -0.016096033, %v1932_v9  ;;  %v1936_v18 = vadd.f32 -0.016096033, %v1933_v10 }
 0x262   : > { %v1928_v11 = vmul.f32 %v1925_v7, %v1901_v22  ;;  %v1970_v19 = vsub.f32 0.0, %v1964_v8 }
 0x263   : > { %v1938_v21 = vmul.f32 %v3019_v0, %v1935_v14  ;;  %v1939_v23 = vmul.f32 %v3021_v1, %v1936_v18  ;;  %v2388_v25 = vpop.eup %2387  ;;  %v2054_v14 = vld [vmem:[#allocation2] sm:$0xf] }
 0x264   : > { %v1931_v20 = vadd.f32 -0.0029546, %v1928_v11  ;;  %2391 = vrcp.f32 %v1970_v19  ;;  %v2390_v28 = vpop.eup %2389  ;;  %v2053_v19 = vld [vmem:[#allocation2 + $0x10] sm:$0xf] }
 0x265   : > { %v1965_v26 = vsub.f32 0.0, %v1938_v21  ;;  %v1966_v27 = vsub.f32 0.0, %v1939_v23 }
 0x266   : > { %v1934_v24 = vmul.f32 %v1931_v20, %v1901_v22 }
 0x267   : > { %v1974_v29 = vmul.f32 %v2388_v25, %v1965_v26  ;;  %v1975_v30 = vmul.f32 %v2390_v28, %v1966_v27 }
 0x268   : > { %v1937_v4 = vadd.f32 -0.016096033, %v1934_v24 }
 0x269   : > { %v1977_v32 = vadd.f32 1.0, %v1974_v29  ;;  %v1978_v34 = vadd.f32 1.0, %v1975_v30 }
 0x26a   : > { %v1940_v5 = vmul.f32 %v3034_v15, %v1937_v4  ;;  %v2392_v35 = vpop.eup %2391 }
 0x26b   : > { %v1980_v1 = vmul.f32 %v1977_v32, %v1887_v31  ;;  %v1981_v22 = vmul.f32 %v1978_v34, %v1888_v33 }
 0x26c   : > { %v1967_v0 = vsub.f32 0.0, %v1940_v5 }
 0x26d   : > { %v1984_v37 = vpack.c.bf16 %v1980_v1, %v1980_v1  ;;  %v1985_v38 = vpack.c.bf16 %v1981_v22, %v1981_v22 }
 0x26e   : > { %v1976_v36 = vmul.f32 %v2392_v35, %v1967_v0 }
 0x26f   : > { %v1991_v41 = vsel %vm215_vm0, %v1984_v37, 0  ;;  %v1994_v15 = vsel %vm215_vm0, %v1985_v38, 0 }
 0x270   : > { %v1979_v40 = vadd.f32 1.0, %v1976_v36  ;;  %2006 = vmatpush.bf16.msra.mxu3 %v1991_v41  ;;  %2019 = vmatpush.bf16.msrb.mxu0 %v1994_v15 }
 0x272   : > { %v1982_v42 = vmul.f32 %v1979_v40, %v1889_v39 }
 0x273   : > { %2297 = vmatmul.msk.bf16.vlgmr.msra.gmra.mxu3 %vm211_vm1, %v1983_v59  ;;  %2298 = vmatmul.msk.bf16.vlgmr.msrb.gmra.mxu0 %vm211_vm1, %v1983_v59 }
 0x274   : > { %v1986_v60 = vpack.c.bf16 %v1982_v42, %v1982_v42 }
 0x276   : > { %v1997_v43 = vsel %vm215_vm0, %v1986_v60, 0 }
 0x277   : > { %2032 = vmatpush.bf16.msrb.mxu1 %v1997_v43 }
 0x27a   : > { %2299 = vmatmul.msk.bf16.vlgmr.msrb.gmra.mxu1 %vm211_vm1, %v1983_v59  ;;  %vm2066_vm1 = vcmask 343040  }
 0x2f0   : > { %v2021_v3 = vpop.f32.mrf.mxu0 }
 0x2f1   : > { %v2039_v44 = vsub.f32 0.0, %v2021_v3 }
 0x2f3   : > { %v2043_v45 = vmul.f32 1.442695, %v2039_v44 }
 0x2f5   : > { %2393 = vpow2.f32 %v2043_v45 }
 0x2f6   : > { %v2008_v46 = vpop.f32.mrf.mxu3 }
 0x2f7   : > { %v2034_v13 = vpop.f32.mrf.mxu1  ;;  %v2038_v48 = vsub.f32 0.0, %v2008_v46 }
 0x2f8   : > { %v2040_v47 = vsub.f32 0.0, %v2034_v13  ;;  %v2023_v49 = vpop.f32.mrf.mxu0 }
 0x2f9   : > { %v2041_v12 = vmul.f32 1.442695, %v2038_v48 }
 0x2fa   : > { %v2045_v50 = vmul.f32 1.442695, %v2040_v47 }
 0x2fb   : > { %v2394_v51 = vpop.eup %2393 }
 0x2fc   : > { %2395 = vpow2.f32 %v2045_v50  ;;  %v2048_v52 = vadd.f32 1.0, %v2394_v51 }
 0x2fd   : > { %2397 = vpow2.f32 %v2041_v12 }
 0x2fe   : > { %2399 = vrcp.f32 %v2048_v52  ;;  %v2010_v16 = vpop.f32.mrf.mxu3 }
 0x2ff   : > { %v2036_v17 = vpop.f32.mrf.mxu1 }
 0x302   : > { %v2396_v53 = vpop.eup %2395 }
 0x303   : > { %v2398_v54 = vpop.eup %2397  ;;  %v2049_v56 = vadd.f32 1.0, %v2396_v53 }
 0x304   : > { %v2047_v55 = vadd.f32 1.0, %v2398_v54  ;;  %v2400_v57 = vpop.eup %2399 }
 0x305   : > { %2401 = vrcp.f32 %v2049_v56  ;;  %2062 = vrot.lane.b32.xlu1 %v2400_v57, %s2511_s11 }
 0x306   : > { %2403 = vrcp.f32 %v2047_v55 }
 0x30b   : > { %v2402_v58 = vpop.eup %2401 }
 0x30c   : > { %v2404_v61 = vpop.eup %2403  ;;  %2064 = vrot.lane.b32.xlu2 %v2402_v58, %s2511_s11 }
 0x30d   : > { %2060 = vrot.lane.b32.xlu0 %v2404_v61, %s2511_s11 }
 0x366   : > { %v2065_v63 = vpop.permute.xlu2 %2064 }
 0x367   : > { %v2076_v2 = vmul.f32 %v2065_v63, %v2056_v62 }
 0x369   : > { %v2082_v8 = vrot.slane %v2076_v2, 4 }
 0x377   : > { %v2063_v7 = vpop.permute.xlu1 %2062 }
 0x378   : > { %v2068_v9 = vsel %vm2066_vm1, %v2063_v7, %v2065_v63 }
 0x379   : > { %v2075_v10 = vmul.f32 %v2068_v9, %v2055_v6 }
 0x37b   : > { %v2084_v11 = vsel %vm215_vm0, %v2075_v10, %v2082_v8 }
 0x37c   : > { %2087 = vrot.lane.b32.xlu1 %v2084_v11, %s2498_s30 }
 0x37f   : > { %v2061_v18 = vpop.permute.xlu0 %2060 }
 0x380   : > { %v2067_v20 = vsel %vm2066_vm1, %v2061_v18, %v2063_v7  ;;  %v2073_v23 = vmul.f32 %v2061_v18, %v2053_v19 }
 0x381   : > { %v2074_v21 = vmul.f32 %v2067_v20, %v2054_v14 }
 0x383   : > { %v2081_v24 = vrot.slane %v2074_v21, 4 }
 0x385   : > { %v2083_v25 = vsel %vm215_vm0, %v2073_v23, %v2081_v24 }
 0x386   : > { %2085 = vrot.lane.b32.xlu0 %v2083_v25, %s2498_s30  ;;  %s2419_s30 = sshra.s32 %s2118_s28, 4  ;;  %s2420_s30 = int_to_ptr.hbm [resolvable:$true] %s2419_s30 }
 0x387   : > { %s2421_s29 = scalar_lea.hbm %s2420_s30, 12  ;;  %p2426_p0 = scmp.lt.s32.totalorder %s2420_s30, %s3112_s3 }
 0x388   : > { %p2422_p11 = scmp.ne.s32.totalorder %s2420_s30, %s2421_s29  ;;  %p2427_p1 = scmp.lt.s32.totalorder %s2425_s7, %s2421_s29 }
 0x38a   : > { %p2423_p12 = pnand %p2422_p11, %p2572_p4  ;;  %p2428_p2 = por %p2427_p1, %p2426_p0 }
 0x38c   : > { %p2424_p13 = pneg %p2423_p12 }
 0x38e   : > { %p2429_p3 = pnand %p2428_p2, %p2424_p13 }
 0x3ee   : > { %v2088_v26 = vpop.permute.xlu1 %2087 }
 0x3ef   : > { %v2090_v27 = vrot.slane %v2088_v26, 4 }
 0x3f1   : > { %v2094_v28 = vsel %vm1013_vm13, %v2088_v26, %v2090_v27 }
 0x3f2   : > { %2098 = vst [vmem:[%s2594_s5 + $0x8] sm:$0xf] %v2094_v28 }
 0x3f8   : > { %v2086_v4 = vpop.permute.xlu0 %2085 }
 0x3f9   : > { %v2089_v29 = vrot.slane %v2086_v4, 4 }
 0x3fb   : > { %v2091_v30 = vsel %vm215_vm0, %v2089_v29, %v2090_v27 }
 0x3fc   : > { %v2093_v5 = vsel %vm1013_vm13, %v2086_v4, %v2091_v30 }
 0x3fd   : > { %2097 = vst [vmem:[%s2594_s5] sm:$0xff] %v2093_v5 }
 0x3fe   : > { %2432 = shalt.err (!%p2429_p3)
}
 0x3ff   : > { %2307 = dma.vmem_to_hbm [thread:$0]  (%p2572_p4), %s2116_s27, 192, %s2118_s28, %s2100_s15  }
 0x400 PF: > { %p2313_p5 = scmp.ge.s32.totalorder %s2485_s17, 2  ;;  %s2129_s26 = sand.u32 1, %s2465_s12  }
 0x401   : > { %s2130_s5 = scalar_lea.sflag [#allocation6], %s2129_s26 }
 0x402   : > { %p2310_p6 = pnand %p2313_p5, %p2579_p8 }
 0x404   : > { %p2311_p7 = pneg %p2310_p6 }
 0x406   : > { %2460 = dma.done.wait (%p2311_p7), %s2130_s5, 192  }
 0x407   : > { %2462 = vsyncadd (%p2311_p7), %s2130_s5, 4294967104  ;;  %s16_s17 = sadd.s32 1, %s2485_s17   ;;  %s3115_s12 = smov %s2469_s13 }
 0x408   : > { %p13_p9 = scmp.ge.s32.totalorder %s16_s17, 4   ;;  %s3116_s13 = smov %s2473_s14 }
 0x409   : > { %s3117_s14 = smov %s2585_s25  ;;  %s3118_s15 = smov %s2481_s16 }
 0x40a   : > { %s3119_s16 = smov %s3121_s20  ;;  %15 = sbr.rel (!%p13_p9) target bundleno = 4 (0x4), region = 108 }
 0x40f   :  { %2136 = vsyncpa [#allocation6], 1 }
 0x410   :  { %2138 = vsyncpa [#allocation6 + $0x1], 1 }
 0x411   :  { %2139 = vsyncmov [#allocation4] }
 0x414   :  { %s2140_s22 = vpop.sfrf %2139 }
 0x415   :  { %p2303_p4 = scmp.ne.s32.totalorder %s2140_s22, 0 }
 0x417   :  { %2144 = shalt.err (%p2303_p4)  }

</bundles_post_ra>
